<compile_context>
chip_gen: v7x
topology: tpu7x:2x2x1
jax: 0.10.0
libtpu: 0.0.40
codegen_flags: <defaults>
</compile_context>

<pallas_src>
import numpy as np

import jax
import jax.numpy as jnp
from jax.experimental import pallas as pl
from jax.experimental.pallas import tpu as pltpu


# ----------------------------------------------------------------------------
# Host-side parameter / constant preprocessing (tiny tables, built under jit).
# ----------------------------------------------------------------------------
def _conv_banded(w_oihw, w_in):
    """(Co,Ci,kh,kw) conv weight -> (kh, W_in*Ci, Wo*Co) banded matrices.

    With an input row block laid out as (rows, W_in*Ci) (lane = w*Ci + ci), a
    valid conv becomes   out[i, j*Co+o] = sum_dh  in[i+dh, :] @ B[dh],
    i.e. kh small matmuls per image and no im2col patch matrix in HBM.
    """
    co, ci, kh, kw = w_oihw.shape
    wo = w_in - kw + 1
    m = np.arange(w_in * ci)
    w_idx, c_idx = m // ci, m % ci
    nn = np.arange(wo * co)
    j_idx, o_idx = nn // co, nn % co
    dw = w_idx[:, None] - j_idx[None, :]                    # (M, N)
    valid = jnp.asarray((dw >= 0) & (dw < kw), jnp.float32)
    dwc = np.clip(dw, 0, kw - 1)
    wt = jnp.transpose(w_oihw.astype(jnp.float32), (2, 3, 1, 0))   # (kh,kw,ci,co)
    b = wt[:, dwc, c_idx[:, None], o_idx[None, :]]          # (kh, M, N)
    return (b * valid[None]).astype(jnp.float32)


def _pool_col_sel(wo, co):
    """Stacked 0/1 column-pool selector (one MXU pass per pool stage).

    Even picks land in lanes [0, Wp*Co); odd picks in [S, S + Wp*Co) with
    S = roundup(Wp*Co, 128), so the post-matmul split is lane-tile aligned.
    """
    wp = wo // 2
    npool = wp * co
    s_off = -(-npool // 128) * 128
    s = np.zeros((wo * co, 2 * s_off), np.float32)
    for pj in range(wp):
        for cc in range(co):
            s[(2 * pj) * co + cc, pj * co + cc] = 1.0
            s[(2 * pj + 1) * co + cc, s_off + pj * co + cc] = 1.0
    return jnp.asarray(s)


def _pool_row_sel(ho):
    """Stacked 0/1 row-pool selector: even rows at sublanes [0, Hp), odd rows
    at [S, S + Hp) with S = roundup(Hp, 8) -> sublane-tile aligned split."""
    hp = ho // 2
    s_off = -(-hp // 8) * 8
    s = np.zeros((2 * s_off, ho), np.float32)
    for pi in range(hp):
        s[pi, 2 * pi] = 1.0
        s[s_off + pi, 2 * pi + 1] = 1.0
    return jnp.asarray(s)


def _pool_row_sel_spread(ho):
    """Row-pool selector for the LAST pool: pooled row i's even pick lands on
    sublane 16*i, its odd pick on sublane 16*i + 8, so fc1 can read each
    pooled row with 8-aligned value slices (no VMEM scratch needed)."""
    hp = ho // 2
    s = np.zeros((16 * hp, ho), np.float32)
    for pi in range(hp):
        s[16 * pi, 2 * pi] = 1.0
        s[16 * pi + 8, 2 * pi + 1] = 1.0
    return jnp.asarray(s)


def _base_grid_ext(h, w):
    """affine_grid basis (align_corners=False): rows [xn; yn; 1], shape (3, H*W)."""
    p = np.arange(h * w)
    j, i = p % w, p // w
    xn = (2.0 * j + 1.0) / w - 1.0
    yn = (2.0 * i + 1.0) / h - 1.0
    return jnp.asarray(np.stack([xn, yn, np.ones_like(xn)]).astype(np.float32))


def _tree_sum(parts):
    """Balanced add tree (shortens the dependent VPU-add chain behind MXU pops)."""
    while len(parts) > 1:
        nxt = [parts[i] + parts[i + 1] for i in range(0, len(parts) - 1, 2)]
        if len(parts) % 2:
            nxt.append(parts[-1])
        parts = nxt
    return parts[0]


# ----------------------------------------------------------------------------
# Fused kernel: localization -> theta (in registers) -> affine_grid+grid_sample
# ----------------------------------------------------------------------------
def _stn_kernel(x_ref, w1_ref, b1_ref, sel1_ref, rsel1_ref,
                w2_ref, b2_ref, sel2_ref, rsel2_ref,
                a1_ref, fc1b_ref, w2x_ref, b2x_ref, w2y_ref, b2y_ref,
                base_ref, o_ref, y1_s):
    f32 = jnp.float32
    h_in, w_in = x_ref.shape[1], x_ref.shape[2]
    kh1 = w1_ref.shape[0]
    ho1 = h_in - kh1 + 1
    hp1, n1 = y1_s.shape
    kh2 = w2_ref.shape[0]
    ho2 = hp1 - kh2 + 1
    hp2, n2, _ = a1_ref.shape
    p = base_ref.shape[1]
    cs1 = sel1_ref.shape[1] // 2       # odd-half lane offset (multiple of 128)
    rs1 = rsel1_ref.shape[0] // 2      # odd-half sublane offset (multiple of 8)
    cs2 = sel2_ref.shape[1] // 2

    # ---------------- conv1 (banded row matmuls) -> maxpool -> relu ----------
    acc1 = _tree_sum([jnp.dot(x_ref[0, dh:dh + ho1, :], w1_ref[dh],
                              preferred_element_type=f32)
                      for dh in range(kh1)]) + b1_ref[...]
    cp1 = jnp.dot(acc1, sel1_ref[...], preferred_element_type=f32)
    cmax1 = jnp.maximum(cp1[:, 0:n1], cp1[:, cs1:cs1 + n1])
    rp1 = jnp.dot(rsel1_ref[...], cmax1, preferred_element_type=f32)
    y1_s[...] = jnp.maximum(
        jnp.maximum(rp1[0:hp1, :], rp1[rs1:rs1 + hp1, :]), 0.0)

    # ----------------------------- conv2 -> maxpool --------------------------
    acc2 = _tree_sum([jnp.dot(y1_s[dh:dh + ho2, :], w2_ref[dh],
                              preferred_element_type=f32)
                      for dh in range(kh2)]) + b2_ref[...]
    cp2 = jnp.dot(acc2, sel2_ref[...], preferred_element_type=f32)
    cmax2 = jnp.maximum(cp2[:, 0:n2], cp2[:, cs2:cs2 + n2])
    rp2 = jnp.dot(rsel2_ref[...], cmax2, preferred_element_type=f32)   # spread rows

    # ---- relu -> fc1 -> relu -> fc2 (theta stays in registers, never HBM) ---
    h1 = fc1b_ref[...]
    for i in range(hp2):
        # pooled row i lives on sublanes 16*i (even pick) and 16*i+8 (odd pick)
        y2_i = jnp.maximum(
            jnp.maximum(rp2[16 * i:16 * i + 1, :],
                        rp2[16 * i + 8:16 * i + 9, :]), 0.0)
        h1 = h1 + jnp.dot(y2_i, a1_ref[i], preferred_element_type=f32)
    h1 = jnp.maximum(h1, 0.0)
    tx = jnp.dot(h1, w2x_ref[...], preferred_element_type=f32) + b2x_ref[...]
    ty = jnp.dot(h1, w2y_ref[...], preferred_element_type=f32) + b2y_ref[...]

    # ------ affine_grid + grid_sample (bilinear, zeros, align_corners=F) -----
    gx = jnp.dot(tx, base_ref[...], preferred_element_type=f32)       # (1, P)
    gy = jnp.dot(ty, base_ref[...], preferred_element_type=f32)
    ix = ((gx + 1.0) * w_in - 1.0) * 0.5
    iy = ((gy + 1.0) * h_in - 1.0) * 0.5
    ix0 = jnp.floor(ix)
    iy0 = jnp.floor(iy)
    wx1 = ix - ix0
    wx0 = 1.0 - wx1
    wy1 = iy - iy0
    wy0 = 1.0 - wy1
    # int32 corner indices; clamp to a sentinel range so the cast is safe and
    # out-of-bounds corners can never match a valid row/col (zeros padding).
    ix0i = jnp.clip(ix0, -2.0, float(w_in)).astype(jnp.int32)
    iy0i = jnp.clip(iy0, -2.0, float(h_in)).astype(jnp.int32)

    rows = jax.lax.broadcasted_iota(jnp.int32, (h_in, p), 0)
    cols = jax.lax.broadcasted_iota(jnp.int32, (w_in, p), 0)
    rw = (jnp.where(rows == iy0i, wy0, 0.0)
          + jnp.where(rows == iy0i + 1, wy1, 0.0))                    # (H, P)
    cw = (jnp.where(cols == ix0i, wx0, 0.0)
          + jnp.where(cols == ix0i + 1, wx1, 0.0))                    # (W, P)

    # separable bilinear gather on x in its NATIVE (H, W) layout:
    #   mix = x @ cw  gathers/blends columns, then row weights + (1,H) reduce.
    mix = jnp.dot(x_ref[0], cw, preferred_element_type=f32)           # (H, P)
    ones_row = jnp.ones((1, h_in), f32)
    o_ref[0] = jnp.dot(ones_row, mix * rw, preferred_element_type=f32)


# ----------------------------------------------------------------------------
# STN forward
# ----------------------------------------------------------------------------
def stn_forward(x_nchw, p):
    n, c, h, w = x_nchw.shape
    assert c == 1, "STN localization net is defined for single-channel input"
    c1, c2 = p["w1"].shape[0], p["w2"].shape[0]
    kh1, kw1 = p["w1"].shape[2], p["w1"].shape[3]
    kh2, kw2 = p["w2"].shape[2], p["w2"].shape[3]
    ho1, wo1 = h - kh1 + 1, w - kw1 + 1
    hp1, wp1 = ho1 // 2, wo1 // 2
    ho2, wo2 = hp1 - kh2 + 1, wp1 - kw2 + 1
    hp2, wp2 = ho2 // 2, wo2 // 2
    nh = p["fc1_w"].shape[0]

    # kernel-friendly constants (tiny; built once per trace)
    w1b = _conv_banded(p["w1"], w)                                   # (kh1, W, Wo1*C1)
    b1r = jnp.tile(p["b1"].astype(jnp.float32), (wo1,)).reshape(1, wo1 * c1)
    sel1, rsel1 = _pool_col_sel(wo1, c1), _pool_row_sel(ho1)
    w2b = _conv_banded(p["w2"], wp1)                                 # (kh2, Wp1*C1, Wo2*C2)
    b2r = jnp.tile(p["b2"].astype(jnp.float32), (wo2,)).reshape(1, wo2 * c2)
    sel2, rsel2 = _pool_col_sel(wo2, c2), _pool_row_sel_spread(ho2)
    # PyTorch (C,H,W) flatten order folded into the fc1 weight:
    a1 = jnp.transpose(p["fc1_w"].astype(jnp.float32).reshape(nh, c2, hp2, wp2),
                       (2, 3, 1, 0)).reshape(hp2, wp2 * c2, nh)      # (h, w*C2+c, o)
    fc1b = p["fc1_b"].astype(jnp.float32).reshape(1, nh)
    fc2w = p["fc2_w"].astype(jnp.float32)                            # (6, nh)
    fc2b = p["fc2_b"].astype(jnp.float32)
    w2x, w2y = fc2w[0:3].T, fc2w[3:6].T                              # (nh, 3) each
    b2x, b2y = fc2b[0:3].reshape(1, 3), fc2b[3:6].reshape(1, 3)
    base = _base_grid_ext(h, w)                                      # (3, H*W)

    def _const(arr):
        nd = arr.ndim
        return pl.BlockSpec(arr.shape, lambda *_: (0,) * nd)

    out = pl.pallas_call(
        _stn_kernel,
        grid=(n,),
        in_specs=[
            pl.BlockSpec((1, h, w), lambda b: (b, 0, 0)),            # image b
            _const(w1b), _const(b1r), _const(sel1), _const(rsel1),
            _const(w2b), _const(b2r), _const(sel2), _const(rsel2),
            _const(a1), _const(fc1b), _const(w2x), _const(b2x),
            _const(w2y), _const(b2y), _const(base),
        ],
        out_specs=pl.BlockSpec((1, 1, h * w), lambda b: (b, 0, 0)),
        out_shape=jax.ShapeDtypeStruct((n, 1, h * w), jnp.float32),
        # y1 stays in VMEM scratch: the banded conv2 reads it at every sublane
        # offset, which is free as a ref load (it is ~1 vreg large).
        scratch_shapes=[pltpu.VMEM((hp1, wp1 * c1), jnp.float32)],
        compiler_params=pltpu.CompilerParams(
            dimension_semantics=("parallel",)),
    )(x_nchw.astype(jnp.float32).reshape(n, h, w), w1b, b1r, sel1, rsel1,
      w2b, b2r, sel2, rsel2, a1, fc1b, w2x, b2x, w2y, b2y, base)
    return out.reshape(n, 1, h, w)


# ----------------------------------------------------------------------------
# Pure-JAX reference of the PyTorch STN forward (for validation only)
# ----------------------------------------------------------------------------
def stn_reference(x_nchw, p):
    n, c, h, w = x_nchw.shape
    hi = jax.lax.Precision.HIGHEST
    x = x_nchw.astype(jnp.float32)
    y = jax.lax.conv_general_dilated(
        x, p["w1"].astype(jnp.float32), (1, 1), "VALID",
        dimension_numbers=("NCHW", "OIHW", "NCHW"), precision=hi)
    y = y + p["b1"].reshape(1, -1, 1, 1)
    y = jax.lax.reduce_window(y, -jnp.inf, jax.lax.max,
                              (1, 1, 2, 2), (1, 1, 2, 2), "VALID")
    y = jnp.maximum(y, 0.0)
    y = jax.lax.conv_general_dilated(
        y, p["w2"].astype(jnp.float32), (1, 1), "VALID",
        dimension_numbers=("NCHW", "OIHW", "NCHW"), precision=hi)
    y = y + p["b2"].reshape(1, -1, 1, 1)
    y = jax.lax.reduce_window(y, -jnp.inf, jax.lax.max,
                              (1, 1, 2, 2), (1, 1, 2, 2), "VALID")
    y = jnp.maximum(y, 0.0)
    h1 = jnp.maximum(jnp.dot(y.reshape(n, -1), p["fc1_w"].T, precision=hi)
                     + p["fc1_b"], 0.0)
    theta = jnp.dot(h1, p["fc2_w"].T, precision=hi) + p["fc2_b"]     # (n, 6)

    xn = (2.0 * jnp.arange(w) + 1.0) / w - 1.0
    yn = (2.0 * jnp.arange(h) + 1.0) / h - 1.0
    xg, yg = jnp.meshgrid(xn, yn)                                    # (h, w)
    gx = (theta[:, 0, None, None] * xg + theta[:, 1, None, None] * yg
          + theta[:, 2, None, None])
    gy = (theta[:, 3, None, None] * xg + theta[:, 4, None, None] * yg
          + theta[:, 5, None, None])
    ix = ((gx + 1.0) * w - 1.0) * 0.5
    iy = ((gy + 1.0) * h - 1.0) * 0.5
    ix0 = jnp.floor(ix)
    iy0 = jnp.floor(iy)
    wx1, wy1 = ix - ix0, iy - iy0
    wx0, wy0 = 1.0 - wx1, 1.0 - wy1
    img = x.reshape(n, h, w)

    def sample_one(im, iy0b, ix0b, wy0b, wy1b, wx0b, wx1b):
        def corner(yi, xi, wgt):
            ok = (yi >= 0) & (yi < h) & (xi >= 0) & (xi < w)
            yc = jnp.clip(yi, 0, h - 1).astype(jnp.int32)
            xc = jnp.clip(xi, 0, w - 1).astype(jnp.int32)
            return jnp.where(ok, im[yc, xc], 0.0) * wgt
        return (corner(iy0b, ix0b, wy0b * wx0b)
                + corner(iy0b, ix0b + 1.0, wy0b * wx1b)
                + corner(iy0b + 1.0, ix0b, wy1b * wx0b)
                + corner(iy0b + 1.0, ix0b + 1.0, wy1b * wx1b))

    out = jax.vmap(sample_one)(img, iy0, ix0, wy0, wy1, wx0, wx1)
    return out.reshape(n, 1, h, w)


if __name__ == "__main__":
    key = jax.random.PRNGKey(0)
    ks = jax.random.split(key, 9)

    N, C, H, W = 2, 1, 24, 24      # 24 -conv7-> 18 -pool-> 9 -conv5-> 5 -pool-> 2
    flatten = 10 * 2 * 2           # = xs_size[1]*xs_size[2]*xs_size[3]

    x = jax.random.normal(ks[0], (N, C, H, W), jnp.float32)

    params = dict(
        w1=jax.random.normal(ks[1], (8, 1, 7, 7), jnp.float32) / jnp.sqrt(49.0),
        b1=jax.random.normal(ks[2], (8,), jnp.float32) * 0.1,
        w2=jax.random.normal(ks[3], (10, 8, 5, 5), jnp.float32) / jnp.sqrt(200.0),
        b2=jax.random.normal(ks[4], (10,), jnp.float32) * 0.1,
        fc1_w=jax.random.normal(ks[5], (32, flatten), jnp.float32)
        / jnp.sqrt(float(flatten)),
        fc1_b=jax.random.normal(ks[6], (32,), jnp.float32) * 0.1,
        # fc_loc2 init per the PyTorch module: zero weight, identity-affine bias
        fc2_w=jnp.zeros((6, 32), jnp.float32),
        fc2_b=jnp.array([1.0, 0.0, 0.0, 0.0, 1.0, 0.0], jnp.float32),
    )

    fwd = jax.jit(stn_forward)

    # (1) Module-default init (zero fc2 weight, identity bias): the sampler
    #     must reproduce the input (identity affine transform).
    out_id = jax.block_until_ready(fwd(x, params))
    assert out_id.shape == (N, C, H, W)
    assert bool(jnp.all(jnp.isfinite(out_id)))
    assert bool(jnp.max(jnp.abs(out_id - x)) < 5e-2)

    # (2) Non-trivial fc2 weights: validate the full localization + sampling
    #     chain against a pure-JAX reference.  Structural bugs (wrong selector,
    #     wrong flatten order, wrong sampler weights) give O(1) errors; the
    #     tolerance only has to absorb MXU rounding.
    params_nz = dict(params)
    params_nz["fc2_w"] = jax.random.normal(ks[7], (6, 32), jnp.float32) * 0.05
    params_nz["fc2_b"] = params["fc2_b"] + \
        jax.random.normal(ks[8], (6,), jnp.float32) * 0.05
    out_k = jax.block_until_ready(fwd(x, params_nz))
    out_r = stn_reference(x, params_nz)
    err = float(jnp.max(jnp.abs(out_k - out_r)))
    assert bool(jnp.all(jnp.isfinite(out_k)))
    assert err < 1e-1, f"max |kernel - reference| = {err}"
    print("KERNEL_OK")
</pallas_src>

<mosaic_0001>
module attributes {stable_mosaic.version = 11 : i64} {
  func.func @_stn_kernel(%arg0: i32, %arg1: memref<1x24x24xf32, #tpu.memory_space<vmem>>, %arg2: memref<7x24x144xf32, #tpu.memory_space<vmem>>, %arg3: memref<1x144xf32, #tpu.memory_space<vmem>>, %arg4: memref<144x256xf32, #tpu.memory_space<vmem>>, %arg5: memref<32x18xf32, #tpu.memory_space<vmem>>, %arg6: memref<5x72x50xf32, #tpu.memory_space<vmem>>, %arg7: memref<1x50xf32, #tpu.memory_space<vmem>>, %arg8: memref<50x256xf32, #tpu.memory_space<vmem>>, %arg9: memref<32x5xf32, #tpu.memory_space<vmem>>, %arg10: memref<2x20x32xf32, #tpu.memory_space<vmem>>, %arg11: memref<1x32xf32, #tpu.memory_space<vmem>>, %arg12: memref<32x3xf32, #tpu.memory_space<vmem>>, %arg13: memref<1x3xf32, #tpu.memory_space<vmem>>, %arg14: memref<32x3xf32, #tpu.memory_space<vmem>>, %arg15: memref<1x3xf32, #tpu.memory_space<vmem>>, %arg16: memref<3x576xf32, #tpu.memory_space<vmem>>, %arg17: memref<1x1x576xf32, #tpu.memory_space<vmem>>, %arg18: memref<9x72xf32, #tpu.memory_space<vmem>>) attributes {dimension_semantics = [#tpu.dimension_semantics<parallel>], iteration_bounds = array<i64: 2>, scalar_prefetch = 0 : i64, scratch_operands = 1 : i64, tpu.core_type = #tpu.core_type<tc>, window_params = [{transform_indices = @transform_0, window_bounds = array<i64: 1, 24, 24>}, {pipeline_mode = #tpu.pipeline_mode<synchronous>, transform_indices = @transform_1, window_bounds = array<i64: 7, 24, 144>}, {pipeline_mode = #tpu.pipeline_mode<synchronous>, transform_indices = @transform_2, window_bounds = array<i64: 1, 144>}, {pipeline_mode = #tpu.pipeline_mode<synchronous>, transform_indices = @transform_3, window_bounds = array<i64: 144, 256>}, {pipeline_mode = #tpu.pipeline_mode<synchronous>, transform_indices = @transform_4, window_bounds = array<i64: 32, 18>}, {pipeline_mode = #tpu.pipeline_mode<synchronous>, transform_indices = @transform_5, window_bounds = array<i64: 5, 72, 50>}, {pipeline_mode = #tpu.pipeline_mode<synchronous>, transform_indices = @transform_6, window_bounds = array<i64: 1, 50>}, {pipeline_mode = #tpu.pipeline_mode<synchronous>, transform_indices = @transform_7, window_bounds = array<i64: 50, 256>}, {pipeline_mode = #tpu.pipeline_mode<synchronous>, transform_indices = @transform_8, window_bounds = array<i64: 32, 5>}, {pipeline_mode = #tpu.pipeline_mode<synchronous>, transform_indices = @transform_9, window_bounds = array<i64: 2, 20, 32>}, {pipeline_mode = #tpu.pipeline_mode<synchronous>, transform_indices = @transform_10, window_bounds = array<i64: 1, 32>}, {pipeline_mode = #tpu.pipeline_mode<synchronous>, transform_indices = @transform_11, window_bounds = array<i64: 32, 3>}, {pipeline_mode = #tpu.pipeline_mode<synchronous>, transform_indices = @transform_12, window_bounds = array<i64: 1, 3>}, {pipeline_mode = #tpu.pipeline_mode<synchronous>, transform_indices = @transform_13, window_bounds = array<i64: 32, 3>}, {pipeline_mode = #tpu.pipeline_mode<synchronous>, transform_indices = @transform_14, window_bounds = array<i64: 1, 3>}, {pipeline_mode = #tpu.pipeline_mode<synchronous>, transform_indices = @transform_15, window_bounds = array<i64: 3, 576>}, {transform_indices = @transform_16, window_bounds = array<i64: 1, 1, 576>}]} {
    %c0 = arith.constant 0 : index
    %c0_0 = arith.constant 0 : index
    %c0_1 = arith.constant 0 : index
    %0 = vector.load %arg1[%c0, %c0_0, %c0_1] : memref<1x24x24xf32, #tpu.memory_space<vmem>>, vector<1x18x24xf32>
    %1 = vector.shape_cast %0 : vector<1x18x24xf32> to vector<18x24xf32>
    %c0_2 = arith.constant 0 : index
    %c0_3 = arith.constant 0 : index
    %c0_4 = arith.constant 0 : index
    %2 = vector.load %arg2[%c0_2, %c0_3, %c0_4] : memref<7x24x144xf32, #tpu.memory_space<vmem>>, vector<1x24x144xf32>
    %3 = vector.shape_cast %2 : vector<1x24x144xf32> to vector<24x144xf32>
    %cst = arith.constant dense<0.000000e+00> : vector<18x144xf32>
    %4 = tpu.matmul %1, %3, %cst {dimension_numbers = #tpu.dot_dimension_numbers<[1], [0], [0], [1], [0, 0, 1, 1], [], []>} : vector<18x24xf32>, vector<24x144xf32>, vector<18x144xf32> -> vector<18x144xf32>
    %c0_5 = arith.constant 0 : index
    %c1 = arith.constant 1 : index
    %c0_6 = arith.constant 0 : index
    %5 = vector.load %arg1[%c0_5, %c1, %c0_6] : memref<1x24x24xf32, #tpu.memory_space<vmem>>, vector<1x18x24xf32>
    %6 = vector.shape_cast %5 : vector<1x18x24xf32> to vector<18x24xf32>
    %c1_7 = arith.constant 1 : index
    %c0_8 = arith.constant 0 : index
    %c0_9 = arith.constant 0 : index
    %7 = vector.load %arg2[%c1_7, %c0_8, %c0_9] : memref<7x24x144xf32, #tpu.memory_space<vmem>>, vector<1x24x144xf32>
    %8 = vector.shape_cast %7 : vector<1x24x144xf32> to vector<24x144xf32>
    %cst_10 = arith.constant dense<0.000000e+00> : vector<18x144xf32>
    %9 = tpu.matmul %6, %8, %cst_10 {dimension_numbers = #tpu.dot_dimension_numbers<[1], [0], [0], [1], [0, 0, 1, 1], [], []>} : vector<18x24xf32>, vector<24x144xf32>, vector<18x144xf32> -> vector<18x144xf32>
    %c0_11 = arith.constant 0 : index
    %c2 = arith.constant 2 : index
    %c0_12 = arith.constant 0 : index
    %10 = vector.load %arg1[%c0_11, %c2, %c0_12] : memref<1x24x24xf32, #tpu.memory_space<vmem>>, vector<1x18x24xf32>
    %11 = vector.shape_cast %10 : vector<1x18x24xf32> to vector<18x24xf32>
    %c2_13 = arith.constant 2 : index
    %c0_14 = arith.constant 0 : index
    %c0_15 = arith.constant 0 : index
    %12 = vector.load %arg2[%c2_13, %c0_14, %c0_15] : memref<7x24x144xf32, #tpu.memory_space<vmem>>, vector<1x24x144xf32>
    %13 = vector.shape_cast %12 : vector<1x24x144xf32> to vector<24x144xf32>
    %cst_16 = arith.constant dense<0.000000e+00> : vector<18x144xf32>
    %14 = tpu.matmul %11, %13, %cst_16 {dimension_numbers = #tpu.dot_dimension_numbers<[1], [0], [0], [1], [0, 0, 1, 1], [], []>} : vector<18x24xf32>, vector<24x144xf32>, vector<18x144xf32> -> vector<18x144xf32>
    %c0_17 = arith.constant 0 : index
    %c3 = arith.constant 3 : index
    %c0_18 = arith.constant 0 : index
    %15 = vector.load %arg1[%c0_17, %c3, %c0_18] : memref<1x24x24xf32, #tpu.memory_space<vmem>>, vector<1x18x24xf32>
    %16 = vector.shape_cast %15 : vector<1x18x24xf32> to vector<18x24xf32>
    %c3_19 = arith.constant 3 : index
    %c0_20 = arith.constant 0 : index
    %c0_21 = arith.constant 0 : index
    %17 = vector.load %arg2[%c3_19, %c0_20, %c0_21] : memref<7x24x144xf32, #tpu.memory_space<vmem>>, vector<1x24x144xf32>
    %18 = vector.shape_cast %17 : vector<1x24x144xf32> to vector<24x144xf32>
    %cst_22 = arith.constant dense<0.000000e+00> : vector<18x144xf32>
    %19 = tpu.matmul %16, %18, %cst_22 {dimension_numbers = #tpu.dot_dimension_numbers<[1], [0], [0], [1], [0, 0, 1, 1], [], []>} : vector<18x24xf32>, vector<24x144xf32>, vector<18x144xf32> -> vector<18x144xf32>
    %c0_23 = arith.constant 0 : index
    %c4 = arith.constant 4 : index
    %c0_24 = arith.constant 0 : index
    %20 = vector.load %arg1[%c0_23, %c4, %c0_24] : memref<1x24x24xf32, #tpu.memory_space<vmem>>, vector<1x18x24xf32>
    %21 = vector.shape_cast %20 : vector<1x18x24xf32> to vector<18x24xf32>
    %c4_25 = arith.constant 4 : index
    %c0_26 = arith.constant 0 : index
    %c0_27 = arith.constant 0 : index
    %22 = vector.load %arg2[%c4_25, %c0_26, %c0_27] : memref<7x24x144xf32, #tpu.memory_space<vmem>>, vector<1x24x144xf32>
    %23 = vector.shape_cast %22 : vector<1x24x144xf32> to vector<24x144xf32>
    %cst_28 = arith.constant dense<0.000000e+00> : vector<18x144xf32>
    %24 = tpu.matmul %21, %23, %cst_28 {dimension_numbers = #tpu.dot_dimension_numbers<[1], [0], [0], [1], [0, 0, 1, 1], [], []>} : vector<18x24xf32>, vector<24x144xf32>, vector<18x144xf32> -> vector<18x144xf32>
    %c0_29 = arith.constant 0 : index
    %c5 = arith.constant 5 : index
    %c0_30 = arith.constant 0 : index
    %25 = vector.load %arg1[%c0_29, %c5, %c0_30] : memref<1x24x24xf32, #tpu.memory_space<vmem>>, vector<1x18x24xf32>
    %26 = vector.shape_cast %25 : vector<1x18x24xf32> to vector<18x24xf32>
    %c5_31 = arith.constant 5 : index
    %c0_32 = arith.constant 0 : index
    %c0_33 = arith.constant 0 : index
    %27 = vector.load %arg2[%c5_31, %c0_32, %c0_33] : memref<7x24x144xf32, #tpu.memory_space<vmem>>, vector<1x24x144xf32>
    %28 = vector.shape_cast %27 : vector<1x24x144xf32> to vector<24x144xf32>
    %cst_34 = arith.constant dense<0.000000e+00> : vector<18x144xf32>
    %29 = tpu.matmul %26, %28, %cst_34 {dimension_numbers = #tpu.dot_dimension_numbers<[1], [0], [0], [1], [0, 0, 1, 1], [], []>} : vector<18x24xf32>, vector<24x144xf32>, vector<18x144xf32> -> vector<18x144xf32>
    %c0_35 = arith.constant 0 : index
    %c6 = arith.constant 6 : index
    %c0_36 = arith.constant 0 : index
    %30 = vector.load %arg1[%c0_35, %c6, %c0_36] : memref<1x24x24xf32, #tpu.memory_space<vmem>>, vector<1x18x24xf32>
    %31 = vector.shape_cast %30 : vector<1x18x24xf32> to vector<18x24xf32>
    %c6_37 = arith.constant 6 : index
    %c0_38 = arith.constant 0 : index
    %c0_39 = arith.constant 0 : index
    %32 = vector.load %arg2[%c6_37, %c0_38, %c0_39] : memref<7x24x144xf32, #tpu.memory_space<vmem>>, vector<1x24x144xf32>
    %33 = vector.shape_cast %32 : vector<1x24x144xf32> to vector<24x144xf32>
    %cst_40 = arith.constant dense<0.000000e+00> : vector<18x144xf32>
    %34 = tpu.matmul %31, %33, %cst_40 {dimension_numbers = #tpu.dot_dimension_numbers<[1], [0], [0], [1], [0, 0, 1, 1], [], []>} : vector<18x24xf32>, vector<24x144xf32>, vector<18x144xf32> -> vector<18x144xf32>
    %35 = arith.addf %4, %9 : vector<18x144xf32>
    %36 = arith.addf %14, %19 : vector<18x144xf32>
    %37 = arith.addf %24, %29 : vector<18x144xf32>
    %38 = arith.addf %35, %36 : vector<18x144xf32>
    %39 = arith.addf %37, %34 : vector<18x144xf32>
    %40 = arith.addf %38, %39 : vector<18x144xf32>
    %c0_41 = arith.constant 0 : index
    %c0_42 = arith.constant 0 : index
    %41 = vector.load %arg3[%c0_41, %c0_42] : memref<1x144xf32, #tpu.memory_space<vmem>>, vector<1x144xf32>
    %42 = vector.broadcast %41 : vector<1x144xf32> to vector<18x144xf32>
    %43 = arith.addf %40, %42 : vector<18x144xf32>
    %c0_43 = arith.constant 0 : index
    %c0_44 = arith.constant 0 : index
    %44 = vector.load %arg4[%c0_43, %c0_44] : memref<144x256xf32, #tpu.memory_space<vmem>>, vector<144x256xf32>
    %cst_45 = arith.constant dense<0.000000e+00> : vector<18x256xf32>
    %45 = tpu.matmul %43, %44, %cst_45 {dimension_numbers = #tpu.dot_dimension_numbers<[1], [0], [0], [1], [0, 0, 1, 1], [], []>} : vector<18x144xf32>, vector<144x256xf32>, vector<18x256xf32> -> vector<18x256xf32>
    %46 = vector.extract_strided_slice %45 {offsets = [0, 0], sizes = [18, 72], strides = [1, 1]} : vector<18x256xf32> to vector<18x72xf32>
    %47 = vector.extract_strided_slice %45 {offsets = [0, 128], sizes = [18, 72], strides = [1, 1]} : vector<18x256xf32> to vector<18x72xf32>
    %48 = arith.maximumf %46, %47 : vector<18x72xf32>
    %c0_46 = arith.constant 0 : index
    %c0_47 = arith.constant 0 : index
    %49 = vector.load %arg5[%c0_46, %c0_47] : memref<32x18xf32, #tpu.memory_space<vmem>>, vector<32x18xf32>
    %cst_48 = arith.constant dense<0.000000e+00> : vector<32x72xf32>
    %50 = tpu.matmul %49, %48, %cst_48 {dimension_numbers = #tpu.dot_dimension_numbers<[1], [0], [0], [1], [0, 0, 1, 1], [], []>} : vector<32x18xf32>, vector<18x72xf32>, vector<32x72xf32> -> vector<32x72xf32>
    %51 = vector.extract_strided_slice %50 {offsets = [0, 0], sizes = [9, 72], strides = [1, 1]} : vector<32x72xf32> to vector<9x72xf32>
    %52 = vector.extract_strided_slice %50 {offsets = [16, 0], sizes = [9, 72], strides = [1, 1]} : vector<32x72xf32> to vector<9x72xf32>
    %53 = arith.maximumf %51, %52 : vector<9x72xf32>
    %cst_49 = arith.constant 0.000000e+00 : f32
    %54 = vector.broadcast %cst_49 : f32 to vector<9x72xf32>
    %55 = arith.maximumf %53, %54 : vector<9x72xf32>
    %c0_50 = arith.constant 0 : index
    %c0_51 = arith.constant 0 : index
    %56 = vector.load %arg18[%c0_50, %c0_51] : memref<9x72xf32, #tpu.memory_space<vmem>>, vector<9x72xf32>
    tpu.vector_store %arg18[%c0_50, %c0_51], %55 {strides = array<i32>} : memref<9x72xf32, #tpu.memory_space<vmem>>, vector<9x72xf32>,
    %c0_52 = arith.constant 0 : index
    %c0_53 = arith.constant 0 : index
    %57 = vector.load %arg18[%c0_52, %c0_53] : memref<9x72xf32, #tpu.memory_space<vmem>>, vector<5x72xf32>
    %c0_54 = arith.constant 0 : index
    %c0_55 = arith.constant 0 : index
    %c0_56 = arith.constant 0 : index
    %58 = vector.load %arg6[%c0_54, %c0_55, %c0_56] : memref<5x72x50xf32, #tpu.memory_space<vmem>>, vector<1x72x50xf32>
    %59 = vector.shape_cast %58 : vector<1x72x50xf32> to vector<72x50xf32>
    %cst_57 = arith.constant dense<0.000000e+00> : vector<5x50xf32>
    %60 = tpu.matmul %57, %59, %cst_57 {dimension_numbers = #tpu.dot_dimension_numbers<[1], [0], [0], [1], [0, 0, 1, 1], [], []>} : vector<5x72xf32>, vector<72x50xf32>, vector<5x50xf32> -> vector<5x50xf32>
    %c1_58 = arith.constant 1 : index
    %c0_59 = arith.constant 0 : index
    %61 = vector.load %arg18[%c1_58, %c0_59] : memref<9x72xf32, #tpu.memory_space<vmem>>, vector<5x72xf32>
    %c1_60 = arith.constant 1 : index
    %c0_61 = arith.constant 0 : index
    %c0_62 = arith.constant 0 : index
    %62 = vector.load %arg6[%c1_60, %c0_61, %c0_62] : memref<5x72x50xf32, #tpu.memory_space<vmem>>, vector<1x72x50xf32>
    %63 = vector.shape_cast %62 : vector<1x72x50xf32> to vector<72x50xf32>
    %cst_63 = arith.constant dense<0.000000e+00> : vector<5x50xf32>
    %64 = tpu.matmul %61, %63, %cst_63 {dimension_numbers = #tpu.dot_dimension_numbers<[1], [0], [0], [1], [0, 0, 1, 1], [], []>} : vector<5x72xf32>, vector<72x50xf32>, vector<5x50xf32> -> vector<5x50xf32>
    %c2_64 = arith.constant 2 : index
    %c0_65 = arith.constant 0 : index
    %65 = vector.load %arg18[%c2_64, %c0_65] : memref<9x72xf32, #tpu.memory_space<vmem>>, vector<5x72xf32>
    %c2_66 = arith.constant 2 : index
    %c0_67 = arith.constant 0 : index
    %c0_68 = arith.constant 0 : index
    %66 = vector.load %arg6[%c2_66, %c0_67, %c0_68] : memref<5x72x50xf32, #tpu.memory_space<vmem>>, vector<1x72x50xf32>
    %67 = vector.shape_cast %66 : vector<1x72x50xf32> to vector<72x50xf32>
    %cst_69 = arith.constant dense<0.000000e+00> : vector<5x50xf32>
    %68 = tpu.matmul %65, %67, %cst_69 {dimension_numbers = #tpu.dot_dimension_numbers<[1], [0], [0], [1], [0, 0, 1, 1], [], []>} : vector<5x72xf32>, vector<72x50xf32>, vector<5x50xf32> -> vector<5x50xf32>
    %c3_70 = arith.constant 3 : index
    %c0_71 = arith.constant 0 : index
    %69 = vector.load %arg18[%c3_70, %c0_71] : memref<9x72xf32, #tpu.memory_space<vmem>>, vector<5x72xf32>
    %c3_72 = arith.constant 3 : index
    %c0_73 = arith.constant 0 : index
    %c0_74 = arith.constant 0 : index
    %70 = vector.load %arg6[%c3_72, %c0_73, %c0_74] : memref<5x72x50xf32, #tpu.memory_space<vmem>>, vector<1x72x50xf32>
    %71 = vector.shape_cast %70 : vector<1x72x50xf32> to vector<72x50xf32>
    %cst_75 = arith.constant dense<0.000000e+00> : vector<5x50xf32>
    %72 = tpu.matmul %69, %71, %cst_75 {dimension_numbers = #tpu.dot_dimension_numbers<[1], [0], [0], [1], [0, 0, 1, 1], [], []>} : vector<5x72xf32>, vector<72x50xf32>, vector<5x50xf32> -> vector<5x50xf32>
    %c4_76 = arith.constant 4 : index
    %c0_77 = arith.constant 0 : index
    %73 = vector.load %arg18[%c4_76, %c0_77] : memref<9x72xf32, #tpu.memory_space<vmem>>, vector<5x72xf32>
    %c4_78 = arith.constant 4 : index
    %c0_79 = arith.constant 0 : index
    %c0_80 = arith.constant 0 : index
    %74 = vector.load %arg6[%c4_78, %c0_79, %c0_80] : memref<5x72x50xf32, #tpu.memory_space<vmem>>, vector<1x72x50xf32>
    %75 = vector.shape_cast %74 : vector<1x72x50xf32> to vector<72x50xf32>
    %cst_81 = arith.constant dense<0.000000e+00> : vector<5x50xf32>
    %76 = tpu.matmul %73, %75, %cst_81 {dimension_numbers = #tpu.dot_dimension_numbers<[1], [0], [0], [1], [0, 0, 1, 1], [], []>} : vector<5x72xf32>, vector<72x50xf32>, vector<5x50xf32> -> vector<5x50xf32>
    %77 = arith.addf %60, %64 : vector<5x50xf32>
    %78 = arith.addf %68, %72 : vector<5x50xf32>
    %79 = arith.addf %77, %78 : vector<5x50xf32>
    %80 = arith.addf %79, %76 : vector<5x50xf32>
    %c0_82 = arith.constant 0 : index
    %c0_83 = arith.constant 0 : index
    %81 = vector.load %arg7[%c0_82, %c0_83] : memref<1x50xf32, #tpu.memory_space<vmem>>, vector<1x50xf32>
    %82 = vector.broadcast %81 : vector<1x50xf32> to vector<5x50xf32>
    %83 = arith.addf %80, %82 : vector<5x50xf32>
    %c0_84 = arith.constant 0 : index
    %c0_85 = arith.constant 0 : index
    %84 = vector.load %arg8[%c0_84, %c0_85] : memref<50x256xf32, #tpu.memory_space<vmem>>, vector<50x256xf32>
    %cst_86 = arith.constant dense<0.000000e+00> : vector<5x256xf32>
    %85 = tpu.matmul %83, %84, %cst_86 {dimension_numbers = #tpu.dot_dimension_numbers<[1], [0], [0], [1], [0, 0, 1, 1], [], []>} : vector<5x50xf32>, vector<50x256xf32>, vector<5x256xf32> -> vector<5x256xf32>
    %86 = vector.extract_strided_slice %85 {offsets = [0, 0], sizes = [5, 20], strides = [1, 1]} : vector<5x256xf32> to vector<5x20xf32>
    %87 = vector.extract_strided_slice %85 {offsets = [0, 128], sizes = [5, 20], strides = [1, 1]} : vector<5x256xf32> to vector<5x20xf32>
    %88 = arith.maximumf %86, %87 : vector<5x20xf32>
    %c0_87 = arith.constant 0 : index
    %c0_88 = arith.constant 0 : index
    %89 = vector.load %arg9[%c0_87, %c0_88] : memref<32x5xf32, #tpu.memory_space<vmem>>, vector<32x5xf32>
    %cst_89 = arith.constant dense<0.000000e+00> : vector<32x20xf32>
    %90 = tpu.matmul %89, %88, %cst_89 {dimension_numbers = #tpu.dot_dimension_numbers<[1], [0], [0], [1], [0, 0, 1, 1], [], []>} : vector<32x5xf32>, vector<5x20xf32>, vector<32x20xf32> -> vector<32x20xf32>
    %c0_90 = arith.constant 0 : index
    %c0_91 = arith.constant 0 : index
    %91 = vector.load %arg11[%c0_90, %c0_91] : memref<1x32xf32, #tpu.memory_space<vmem>>, vector<1x32xf32>
    %92 = vector.extract_strided_slice %90 {offsets = [0, 0], sizes = [1, 20], strides = [1, 1]} : vector<32x20xf32> to vector<1x20xf32>
    %93 = vector.extract_strided_slice %90 {offsets = [8, 0], sizes = [1, 20], strides = [1, 1]} : vector<32x20xf32> to vector<1x20xf32>
    %94 = arith.maximumf %92, %93 : vector<1x20xf32>
    %cst_92 = arith.constant 0.000000e+00 : f32
    %95 = vector.broadcast %cst_92 : f32 to vector<1x20xf32>
    %96 = arith.maximumf %94, %95 : vector<1x20xf32>
    %c0_93 = arith.constant 0 : index
    %c0_94 = arith.constant 0 : index
    %c0_95 = arith.constant 0 : index
    %97 = vector.load %arg10[%c0_93, %c0_94, %c0_95] : memref<2x20x32xf32, #tpu.memory_space<vmem>>, vector<1x20x32xf32>
    %98 = vector.shape_cast %97 : vector<1x20x32xf32> to vector<20x32xf32>
    %cst_96 = arith.constant dense<0.000000e+00> : vector<1x32xf32>
    %99 = tpu.matmul %96, %98, %cst_96 {dimension_numbers = #tpu.dot_dimension_numbers<[1], [0], [0], [1], [0, 0, 1, 1], [], []>} : vector<1x20xf32>, vector<20x32xf32>, vector<1x32xf32> -> vector<1x32xf32>
    %100 = arith.addf %91, %99 : vector<1x32xf32>
    %101 = vector.extract_strided_slice %90 {offsets = [16, 0], sizes = [1, 20], strides = [1, 1]} : vector<32x20xf32> to vector<1x20xf32>
    %102 = vector.extract_strided_slice %90 {offsets = [24, 0], sizes = [1, 20], strides = [1, 1]} : vector<32x20xf32> to vector<1x20xf32>
    %103 = arith.maximumf %101, %102 : vector<1x20xf32>
    %cst_97 = arith.constant 0.000000e+00 : f32
    %104 = vector.broadcast %cst_97 : f32 to vector<1x20xf32>
    %105 = arith.maximumf %103, %104 : vector<1x20xf32>
    %c1_98 = arith.constant 1 : index
    %c0_99 = arith.constant 0 : index
    %c0_100 = arith.constant 0 : index
    %106 = vector.load %arg10[%c1_98, %c0_99, %c0_100] : memref<2x20x32xf32, #tpu.memory_space<vmem>>, vector<1x20x32xf32>
    %107 = vector.shape_cast %106 : vector<1x20x32xf32> to vector<20x32xf32>
    %cst_101 = arith.constant dense<0.000000e+00> : vector<1x32xf32>
    %108 = tpu.matmul %105, %107, %cst_101 {dimension_numbers = #tpu.dot_dimension_numbers<[1], [0], [0], [1], [0, 0, 1, 1], [], []>} : vector<1x20xf32>, vector<20x32xf32>, vector<1x32xf32> -> vector<1x32xf32>
    %109 = arith.addf %100, %108 : vector<1x32xf32>
    %cst_102 = arith.constant 0.000000e+00 : f32
    %110 = vector.broadcast %cst_102 : f32 to vector<1x32xf32>
    %111 = arith.maximumf %109, %110 : vector<1x32xf32>
    %c0_103 = arith.constant 0 : index
    %c0_104 = arith.constant 0 : index
    %112 = vector.load %arg12[%c0_103, %c0_104] : memref<32x3xf32, #tpu.memory_space<vmem>>, vector<32x3xf32>
    %cst_105 = arith.constant dense<0.000000e+00> : vector<1x3xf32>
    %113 = tpu.matmul %111, %112, %cst_105 {dimension_numbers = #tpu.dot_dimension_numbers<[1], [0], [0], [1], [0, 0, 1, 1], [], []>} : vector<1x32xf32>, vector<32x3xf32>, vector<1x3xf32> -> vector<1x3xf32>
    %c0_106 = arith.constant 0 : index
    %c0_107 = arith.constant 0 : index
    %114 = vector.load %arg13[%c0_106, %c0_107] : memref<1x3xf32, #tpu.memory_space<vmem>>, vector<1x3xf32>
    %115 = arith.addf %113, %114 : vector<1x3xf32>
    %c0_108 = arith.constant 0 : index
    %c0_109 = arith.constant 0 : index
    %116 = vector.load %arg14[%c0_108, %c0_109] : memref<32x3xf32, #tpu.memory_space<vmem>>, vector<32x3xf32>
    %cst_110 = arith.constant dense<0.000000e+00> : vector<1x3xf32>
    %117 = tpu.matmul %111, %116, %cst_110 {dimension_numbers = #tpu.dot_dimension_numbers<[1], [0], [0], [1], [0, 0, 1, 1], [], []>} : vector<1x32xf32>, vector<32x3xf32>, vector<1x3xf32> -> vector<1x3xf32>
    %c0_111 = arith.constant 0 : index
    %c0_112 = arith.constant 0 : index
    %118 = vector.load %arg15[%c0_111, %c0_112] : memref<1x3xf32, #tpu.memory_space<vmem>>, vector<1x3xf32>
    %119 = arith.addf %117, %118 : vector<1x3xf32>
    %c0_113 = arith.constant 0 : index
    %c0_114 = arith.constant 0 : index
    %120 = vector.load %arg16[%c0_113, %c0_114] : memref<3x576xf32, #tpu.memory_space<vmem>>, vector<3x576xf32>
    %cst_115 = arith.constant dense<0.000000e+00> : vector<1x576xf32>
    %121 = tpu.matmul %115, %120, %cst_115 {dimension_numbers = #tpu.dot_dimension_numbers<[1], [0], [0], [1], [0, 0, 1, 1], [], []>} : vector<1x3xf32>, vector<3x576xf32>, vector<1x576xf32> -> vector<1x576xf32>
    %c0_116 = arith.constant 0 : index
    %c0_117 = arith.constant 0 : index
    %122 = vector.load %arg16[%c0_116, %c0_117] : memref<3x576xf32, #tpu.memory_space<vmem>>, vector<3x576xf32>
    %cst_118 = arith.constant dense<0.000000e+00> : vector<1x576xf32>
    %123 = tpu.matmul %119, %122, %cst_118 {dimension_numbers = #tpu.dot_dimension_numbers<[1], [0], [0], [1], [0, 0, 1, 1], [], []>} : vector<1x3xf32>, vector<3x576xf32>, vector<1x576xf32> -> vector<1x576xf32>
    %cst_119 = arith.constant 1.000000e+00 : f32
    %124 = vector.broadcast %cst_119 : f32 to vector<1x576xf32>
    %125 = arith.addf %121, %124 : vector<1x576xf32>
    %cst_120 = arith.constant 2.400000e+01 : f32
    %126 = vector.broadcast %cst_120 : f32 to vector<1x576xf32>
    %127 = arith.mulf %125, %126 : vector<1x576xf32>
    %cst_121 = arith.constant 1.000000e+00 : f32
    %128 = vector.broadcast %cst_121 : f32 to vector<1x576xf32>
    %129 = arith.subf %127, %128 : vector<1x576xf32>
    %cst_122 = arith.constant 5.000000e-01 : f32
    %130 = vector.broadcast %cst_122 : f32 to vector<1x576xf32>
    %131 = arith.mulf %129, %130 : vector<1x576xf32>
    %cst_123 = arith.constant 1.000000e+00 : f32
    %132 = vector.broadcast %cst_123 : f32 to vector<1x576xf32>
    %133 = arith.addf %123, %132 : vector<1x576xf32>
    %cst_124 = arith.constant 2.400000e+01 : f32
    %134 = vector.broadcast %cst_124 : f32 to vector<1x576xf32>
    %135 = arith.mulf %133, %134 : vector<1x576xf32>
    %cst_125 = arith.constant 1.000000e+00 : f32
    %136 = vector.broadcast %cst_125 : f32 to vector<1x576xf32>
    %137 = arith.subf %135, %136 : vector<1x576xf32>
    %cst_126 = arith.constant 5.000000e-01 : f32
    %138 = vector.broadcast %cst_126 : f32 to vector<1x576xf32>
    %139 = arith.mulf %137, %138 : vector<1x576xf32>
    %140 = math.floor %131 : vector<1x576xf32>
    %141 = math.floor %139 : vector<1x576xf32>
    %142 = arith.subf %131, %140 : vector<1x576xf32>
    %cst_127 = arith.constant 1.000000e+00 : f32
    %143 = vector.broadcast %cst_127 : f32 to vector<1x576xf32>
    %144 = arith.subf %143, %142 : vector<1x576xf32>
    %145 = arith.subf %139, %141 : vector<1x576xf32>
    %cst_128 = arith.constant 1.000000e+00 : f32
    %146 = vector.broadcast %cst_128 : f32 to vector<1x576xf32>
    %147 = arith.subf %146, %145 : vector<1x576xf32>
    %cst_129 = arith.constant -2.000000e+00 : f32
    %cst_130 = arith.constant 2.400000e+01 : f32
    %148 = vector.broadcast %cst_129 : f32 to vector<1x576xf32>
    %149 = arith.maximumf %148, %140 : vector<1x576xf32>
    %150 = vector.broadcast %cst_130 : f32 to vector<1x576xf32>
    %151 = arith.minimumf %150, %149 : vector<1x576xf32>
    %152 = arith.fptosi %151 : vector<1x576xf32> to vector<1x576xi32>
    %cst_131 = arith.constant -2.000000e+00 : f32
    %cst_132 = arith.constant 2.400000e+01 : f32
    %153 = vector.broadcast %cst_131 : f32 to vector<1x576xf32>
    %154 = arith.maximumf %153, %141 : vector<1x576xf32>
    %155 = vector.broadcast %cst_132 : f32 to vector<1x576xf32>
    %156 = arith.minimumf %155, %154 : vector<1x576xf32>
    %157 = arith.fptosi %156 : vector<1x576xf32> to vector<1x576xi32>
    %158 = tpu.iota {dimensions = array<i32: 0>} : vector<24x576xi32>
    %159 = tpu.iota {dimensions = array<i32: 0>} : vector<24x576xi32>
    %160 = vector.broadcast %157 : vector<1x576xi32> to vector<24x576xi32>
    %161 = arith.cmpi eq, %158, %160 : vector<24x576xi32>
    %cst_133 = arith.constant 0.000000e+00 : f32
    %162 = vector.shape_cast %147 : vector<1x576xf32> to vector<1x576xf32>
    %163 = vector.broadcast %162 : vector<1x576xf32> to vector<24x576xf32>
    %164 = vector.broadcast %cst_133 : f32 to vector<24x576xf32>
    %165 = arith.select %161, %163, %164 : vector<24x576xi1>, vector<24x576xf32>
    %c1_i32 = arith.constant 1 : i32
    %166 = vector.broadcast %c1_i32 : i32 to vector<1x576xi32>
    %167 = arith.addi %157, %166 : vector<1x576xi32>
    %168 = vector.broadcast %167 : vector<1x576xi32> to vector<24x576xi32>
    %169 = arith.cmpi eq, %158, %168 : vector<24x576xi32>
    %cst_134 = arith.constant 0.000000e+00 : f32
    %170 = vector.shape_cast %145 : vector<1x576xf32> to vector<1x576xf32>
    %171 = vector.broadcast %170 : vector<1x576xf32> to vector<24x576xf32>
    %172 = vector.broadcast %cst_134 : f32 to vector<24x576xf32>
    %173 = arith.select %169, %171, %172 : vector<24x576xi1>, vector<24x576xf32>
    %174 = arith.addf %165, %173 : vector<24x576xf32>
    %175 = vector.broadcast %152 : vector<1x576xi32> to vector<24x576xi32>
    %176 = arith.cmpi eq, %159, %175 : vector<24x576xi32>
    %cst_135 = arith.constant 0.000000e+00 : f32
    %177 = vector.shape_cast %144 : vector<1x576xf32> to vector<1x576xf32>
    %178 = vector.broadcast %177 : vector<1x576xf32> to vector<24x576xf32>
    %179 = vector.broadcast %cst_135 : f32 to vector<24x576xf32>
    %180 = arith.select %176, %178, %179 : vector<24x576xi1>, vector<24x576xf32>
    %c1_i32_136 = arith.constant 1 : i32
    %181 = vector.broadcast %c1_i32_136 : i32 to vector<1x576xi32>
    %182 = arith.addi %152, %181 : vector<1x576xi32>
    %183 = vector.broadcast %182 : vector<1x576xi32> to vector<24x576xi32>
    %184 = arith.cmpi eq, %159, %183 : vector<24x576xi32>
    %cst_137 = arith.constant 0.000000e+00 : f32
    %185 = vector.shape_cast %142 : vector<1x576xf32> to vector<1x576xf32>
    %186 = vector.broadcast %185 : vector<1x576xf32> to vector<24x576xf32>
    %187 = vector.broadcast %cst_137 : f32 to vector<24x576xf32>
    %188 = arith.select %184, %186, %187 : vector<24x576xi1>, vector<24x576xf32>
    %189 = arith.addf %180, %188 : vector<24x576xf32>
    %c0_138 = arith.constant 0 : index
    %c0_139 = arith.constant 0 : index
    %c0_140 = arith.constant 0 : index
    %190 = vector.load %arg1[%c0_138, %c0_139, %c0_140] : memref<1x24x24xf32, #tpu.memory_space<vmem>>, vector<1x24x24xf32>
    %191 = vector.shape_cast %190 : vector<1x24x24xf32> to vector<24x24xf32>
    %cst_141 = arith.constant dense<0.000000e+00> : vector<24x576xf32>
    %192 = tpu.matmul %191, %189, %cst_141 {dimension_numbers = #tpu.dot_dimension_numbers<[1], [0], [0], [1], [0, 0, 1, 1], [], []>} : vector<24x24xf32>, vector<24x576xf32>, vector<24x576xf32> -> vector<24x576xf32>
    %cst_142 = arith.constant 1.000000e+00 : f32
    %193 = vector.broadcast %cst_142 : f32 to vector<1x24xf32>
    %194 = arith.mulf %192, %174 : vector<24x576xf32>
    %cst_143 = arith.constant dense<0.000000e+00> : vector<1x576xf32>
    %195 = tpu.matmul %193, %194, %cst_143 {dimension_numbers = #tpu.dot_dimension_numbers<[1], [0], [0], [1], [0, 0, 1, 1], [], []>} : vector<1x24xf32>, vector<24x576xf32>, vector<1x576xf32> -> vector<1x576xf32>
    %c0_144 = arith.constant 0 : index
    %c0_145 = arith.constant 0 : index
    %c0_146 = arith.constant 0 : index
    %196 = vector.load %arg17[%c0_144, %c0_145, %c0_146] : memref<1x1x576xf32, #tpu.memory_space<vmem>>, vector<1x1x576xf32>
    %197 = vector.shape_cast %196 : vector<1x1x576xf32> to vector<1x576xf32>
    %198 = vector.shape_cast %195 : vector<1x576xf32> to vector<1x1x576xf32>
    tpu.vector_store %arg17[%c0_144, %c0_145, %c0_146], %198 {strides = array<i32>} : memref<1x1x576xf32, #tpu.memory_space<vmem>>, vector<1x1x576xf32>,
    return
  }
  func.func @transform_0(%arg0: i32) -> (i32, i32, i32) {
    %c0_i32 = arith.constant 0 : i32
    %c0_i32_0 = arith.constant 0 : i32
    %c0_i32_1 = arith.constant 0 : i32
    return %arg0, %c0_i32, %c0_i32_0 : i32, i32, i32
  }
  func.func @transform_1(%arg0: i32) -> (i32, i32, i32) {
    %c0_i32 = arith.constant 0 : i32
    %c0_i32_0 = arith.constant 0 : i32
    %c0_i32_1 = arith.constant 0 : i32
    %c0_i32_2 = arith.constant 0 : i32
    return %c0_i32, %c0_i32_0, %c0_i32_1 : i32, i32, i32
  }
  func.func @transform_2(%arg0: i32) -> (i32, i32) {
    %c0_i32 = arith.constant 0 : i32
    %c0_i32_0 = arith.constant 0 : i32
    %c0_i32_1 = arith.constant 0 : i32
    return %c0_i32, %c0_i32_0 : i32, i32
  }
  func.func @transform_3(%arg0: i32) -> (i32, i32) {
    %c0_i32 = arith.constant 0 : i32
    %c0_i32_0 = arith.constant 0 : i32
    %c0_i32_1 = arith.constant 0 : i32
    return %c0_i32, %c0_i32_0 : i32, i32
  }
  func.func @transform_4(%arg0: i32) -> (i32, i32) {
    %c0_i32 = arith.constant 0 : i32
    %c0_i32_0 = arith.constant 0 : i32
    %c0_i32_1 = arith.constant 0 : i32
    return %c0_i32, %c0_i32_0 : i32, i32
  }
  func.func @transform_5(%arg0: i32) -> (i32, i32, i32) {
    %c0_i32 = arith.constant 0 : i32
    %c0_i32_0 = arith.constant 0 : i32
    %c0_i32_1 = arith.constant 0 : i32
    %c0_i32_2 = arith.constant 0 : i32
    return %c0_i32, %c0_i32_0, %c0_i32_1 : i32, i32, i32
  }
  func.func @transform_6(%arg0: i32) -> (i32, i32) {
    %c0_i32 = arith.constant 0 : i32
    %c0_i32_0 = arith.constant 0 : i32
    %c0_i32_1 = arith.constant 0 : i32
    return %c0_i32, %c0_i32_0 : i32, i32
  }
  func.func @transform_7(%arg0: i32) -> (i32, i32) {
    %c0_i32 = arith.constant 0 : i32
    %c0_i32_0 = arith.constant 0 : i32
    %c0_i32_1 = arith.constant 0 : i32
    return %c0_i32, %c0_i32_0 : i32, i32
  }
  func.func @transform_8(%arg0: i32) -> (i32, i32) {
    %c0_i32 = arith.constant 0 : i32
    %c0_i32_0 = arith.constant 0 : i32
    %c0_i32_1 = arith.constant 0 : i32
    return %c0_i32, %c0_i32_0 : i32, i32
  }
  func.func @transform_9(%arg0: i32) -> (i32, i32, i32) {
    %c0_i32 = arith.constant 0 : i32
    %c0_i32_0 = arith.constant 0 : i32
    %c0_i32_1 = arith.constant 0 : i32
    %c0_i32_2 = arith.constant 0 : i32
    return %c0_i32, %c0_i32_0, %c0_i32_1 : i32, i32, i32
  }
  func.func @transform_10(%arg0: i32) -> (i32, i32) {
    %c0_i32 = arith.constant 0 : i32
    %c0_i32_0 = arith.constant 0 : i32
    %c0_i32_1 = arith.constant 0 : i32
    return %c0_i32, %c0_i32_0 : i32, i32
  }
  func.func @transform_11(%arg0: i32) -> (i32, i32) {
    %c0_i32 = arith.constant 0 : i32
    %c0_i32_0 = arith.constant 0 : i32
    %c0_i32_1 = arith.constant 0 : i32
    return %c0_i32, %c0_i32_0 : i32, i32
  }
  func.func @transform_12(%arg0: i32) -> (i32, i32) {
    %c0_i32 = arith.constant 0 : i32
    %c0_i32_0 = arith.constant 0 : i32
    %c0_i32_1 = arith.constant 0 : i32
    return %c0_i32, %c0_i32_0 : i32, i32
  }
  func.func @transform_13(%arg0: i32) -> (i32, i32) {
    %c0_i32 = arith.constant 0 : i32
    %c0_i32_0 = arith.constant 0 : i32
    %c0_i32_1 = arith.constant 0 : i32
    return %c0_i32, %c0_i32_0 : i32, i32
  }
  func.func @transform_14(%arg0: i32) -> (i32, i32) {
    %c0_i32 = arith.constant 0 : i32
    %c0_i32_0 = arith.constant 0 : i32
    %c0_i32_1 = arith.constant 0 : i32
    return %c0_i32, %c0_i32_0 : i32, i32
  }
  func.func @transform_15(%arg0: i32) -> (i32, i32) {
    %c0_i32 = arith.constant 0 : i32
    %c0_i32_0 = arith.constant 0 : i32
    %c0_i32_1 = arith.constant 0 : i32
    return %c0_i32, %c0_i32_0 : i32, i32
  }
  func.func @transform_16(%arg0: i32) -> (i32, i32, i32) {
    %c0_i32 = arith.constant 0 : i32
    %c0_i32_0 = arith.constant 0 : i32
    %c0_i32_1 = arith.constant 0 : i32
    return %arg0, %c0_i32, %c0_i32_0 : i32, i32, i32
  }
}

</mosaic_0001>

<bundles_post_ra>
// kernel: tile.13
= control target key start
LH: loop header
LB: loop body
LE: loop exit
PB: predicated region body
PF: predicated region fallthrough
CT: control target
= control target key end

     0   :  { %s34_s0 = inlined_call_operand.vmem [shape: f32[8], index: 0, kind: input, shape index: {}]   ;;  %s35_s1 = inlined_call_operand.vmem [shape: f32[18,8], index: 1, kind: output, shape index: {}]  }
   0x1   :  { %v4_v0 = vld [vmem:[%s34_s0] ss:$0 sm:$0xff] }
   0x2   :  { %5 = vst [vmem:[%s35_s1] sm:$0xff] %v4_v0  ;;  %10 = vst [vmem:[%s35_s1 + $0x8] sm:$0xff] %v4_v0 }
   0x3   :  { %11 = vst [vmem:[%s35_s1 + $0x10] sm:$0xff] %v4_v0 }

// kernel: tile.14
= control target key start
LH: loop header
LB: loop body
LE: loop exit
PB: predicated region body
PF: predicated region fallthrough
CT: control target
= control target key end

     0   :  { %s139_s10 = smov 120   ;;  %s140_s11 = smov 104   ;;  %vm4_vm0 = vcmask 64512   ;;  %vm10_vm1 = vcmask 1048512   ;;  %vm16_vm2 = vcmask 982912   ;;  %vm22_vm3 = vcmask 917312   ;;  %s218_s0 = inlined_call_operand.vmem [shape: f32[18,8], index: 0, kind: input, shape index: {}]   ;;  %s219_s1 = inlined_call_operand.vmem [shape: f32[1,144], index: 1, kind: output, shape index: {}]  }
   0x1   :  { %v108_v0 = vld [vmem:[%s218_s0 + $0xf] sm:$0x1]   ;;  %v110_v1 = vld [vmem:[%s218_s0 + $0xd] sm:$0x1]   ;;  %v109_v2 = vld [vmem:[%s218_s0 + $0xe] sm:$0x1]  }
   0x2   :  { %8 = vrot.lane.b32.xlu0 %v108_v0, %s139_s10  ;;  %20 = vrot.lane.b32.xlu1 %v110_v1, %s140_s11  ;;  %v111_v3 = vld [vmem:[%s218_s0 + $0xc] sm:$0x1]   ;;  %s141_s16 = smov 112   ;;  %s142_s17 = smov 96   ;;  %v112_v4 = vld [vmem:[%s218_s0 + $0xb] sm:$0x1]  }
   0x3   :  { %v113_v5 = vld [vmem:[%s218_s0 + $0xa] sm:$0x1]   ;;  %s2_s22 = smov 3  ;;  %s143_s23 = smov 88   ;;  %v114_v7 = vld [vmem:[%s218_s0 + $0x9] sm:$0x1]  }
   0x4   :  { %s144_s24 = smov 80   ;;  %v3_v6 = vld [vmem:[%s218_s0] ss:$16 sm:%s2_s22]   ;;  %v115_v8 = vld [vmem:[%s218_s0 + $0x8] sm:$0x1]   ;;  %s145_s2 = smov 72  }
   0x5   :  { %5 = vst.msk [vmem:[#allocation0] ss:$8 sm:$0x3] %vm4_vm0, %v3_v6   ;;  %s146_s3 = smov 64   ;;  %v116_v9 = vld [vmem:[%s218_s0 + $0x7] sm:$0x1]  }
   0x6   :  { %14 = vrot.lane.b32.xlu0 %v109_v2, %s141_s16  ;;  %26 = vrot.lane.b32.xlu1 %v111_v3, %s142_s17  ;;  %v117_v10 = vld [vmem:[%s218_s0 + $0x6] sm:$0x1]   ;;  %s147_s8 = smov 56   ;;  %s148_s9 = smov 48   ;;  %v118_v11 = vld [vmem:[%s218_s0 + $0x5] sm:$0x1]  }
   0x7   :  { %v119_v12 = vld [vmem:[%s218_s0 + $0x4] sm:$0x1]   ;;  %s149_s14 = smov 40   ;;  %s150_s15 = smov 32   ;;  %v120_v13 = vld [vmem:[%s218_s0 + $0x3] sm:$0x1]  }
   0x8   :  { %v121_v14 = vld [vmem:[%s218_s0 + $0x2] sm:$0x1]   ;;  %s91_s20 = smov 3  ;;  %s151_s21 = smov 24   ;;  %vm28_vm4 = vcmask 851712   ;;  %vm34_vm5 = vcmask 786112  }
   0x9   :  { %s152_s22 = smov 16   ;;  %v122_v15 = vld [vmem:[%s218_s0 + $0x1] ss:$16 sm:%s91_s20]   ;;  %s153_s0 = smov 8   ;;  %vm40_vm6 = vcmask 720512   ;;  %vm46_vm7 = vcmask 654912  }
   0xa   :  { %32 = vrot.lane.b32.xlu0 %v112_v4, %s143_s23  ;;  %38 = vrot.lane.b32.xlu1 %v113_v5, %s144_s24  ;;  %vm52_vm8 = vcmask 589312   ;;  %vm58_vm9 = vcmask 523712   ;;  %vm64_vm10 = vcmask 458112   ;;  %vm70_vm11 = vcmask 392512  }
   0xb   :  { %vm76_vm12 = vcmask 326912   ;;  %vm82_vm13 = vcmask 261312   ;;  %vm88_vm14 = vcmask 195712   ;;  %vm95_vm15 = vcmask 130112  }
   0xe   :  { %44 = vrot.lane.b32.xlu0 %v114_v7, %s145_s2  ;;  %50 = vrot.lane.b32.xlu1 %v115_v8, %s146_s3 }
  0x12   :  { %56 = vrot.lane.b32.xlu0 %v116_v9, %s147_s8  ;;  %62 = vrot.lane.b32.xlu1 %v117_v10, %s148_s9 }
  0x16   :  { %68 = vrot.lane.b32.xlu0 %v118_v11, %s149_s14  ;;  %74 = vrot.lane.b32.xlu1 %v119_v12, %s150_s15 }
  0x1a   :  { %80 = vrot.lane.b32.xlu0 %v120_v13, %s151_s21  ;;  %86 = vrot.lane.b32.xlu1 %v121_v14, %s152_s22 }
  0x1e   :  { %93 = vrot.lane.b32.xlu0 %v122_v15, %s153_s0 }
  0x74   :  { %v9_v16 = vpop.permute.xlu0 %8   ;;  %v21_v17 = vpop.permute.xlu1 %20  }
  0x75   :  { %11 = vst.msk [vmem:[#allocation0] sm:$0x1] %vm10_vm1, %v9_v16  }
  0x78   :  { %v15_v18 = vpop.permute.xlu0 %14   ;;  %v27_v19 = vpop.permute.xlu1 %26  }
  0x79   :  { %17 = vst.msk [vmem:[#allocation0] sm:$0x1] %vm16_vm2, %v15_v18  }
  0x7a   :  { %23 = vst.msk [vmem:[#allocation0] sm:$0x1] %vm22_vm3, %v21_v17  }
  0x7b   :  { %29 = vst.msk [vmem:[#allocation0] sm:$0x1] %vm28_vm4, %v27_v19  }
  0x7c   :  { %v33_v20 = vpop.permute.xlu0 %32   ;;  %v39_v21 = vpop.permute.xlu1 %38  }
  0x7d   :  { %35 = vst.msk [vmem:[#allocation0] sm:$0x1] %vm34_vm5, %v33_v20  }
  0x7e   :  { %41 = vst.msk [vmem:[#allocation0] sm:$0x1] %vm40_vm6, %v39_v21  }
  0x80   :  { %v45_v22 = vpop.permute.xlu0 %44   ;;  %v51_v23 = vpop.permute.xlu1 %50  }
  0x81   :  { %47 = vst.msk [vmem:[#allocation0] sm:$0x1] %vm46_vm7, %v45_v22  }
  0x82   :  { %53 = vst.msk [vmem:[#allocation0] sm:$0x1] %vm52_vm8, %v51_v23  }
  0x84   :  { %v57_v24 = vpop.permute.xlu0 %56   ;;  %v63_v25 = vpop.permute.xlu1 %62  }
  0x85   :  { %59 = vst.msk [vmem:[#allocation0] sm:$0x1] %vm58_vm9, %v57_v24  }
  0x86   :  { %65 = vst.msk [vmem:[#allocation0] sm:$0x1] %vm64_vm10, %v63_v25  }
  0x88   :  { %v69_v26 = vpop.permute.xlu0 %68   ;;  %v75_v27 = vpop.permute.xlu1 %74  }
  0x89   :  { %71 = vst.msk [vmem:[#allocation0] sm:$0x1] %vm70_vm11, %v69_v26  }
  0x8a   :  { %77 = vst.msk [vmem:[#allocation0] sm:$0x1] %vm76_vm12, %v75_v27  }
  0x8c   :  { %v81_v28 = vpop.permute.xlu0 %80   ;;  %v87_v29 = vpop.permute.xlu1 %86  }
  0x8d   :  { %83 = vst.msk [vmem:[#allocation0] sm:$0x1] %vm82_vm13, %v81_v28  }
  0x8e   :  { %89 = vst.msk [vmem:[#allocation0] sm:$0x1] %vm88_vm14, %v87_v29  }
  0x90   :  { %v94_v30 = vpop.permute.xlu0 %93  }
  0x91   :  { %96 = vst.msk [vmem:[#allocation0] ss:$8 sm:$0x3] %vm95_vm15, %v94_v30  }
  0x98   :  { %v100_v31 = vld [vmem:[#allocation0] sm:$0x1]  ;;  %v104_v32 = vld [vmem:[#allocation0 + $0x8] sm:$0x1] }
  0x99   :  { %102 = vst [vmem:[%s219_s1] sm:$0x1] %v100_v31  ;;  %123 = vst [vmem:[%s219_s1 + $0x1] sm:$0x1] %v104_v32 }

// kernel: tile.18
= control target key start
LH: loop header
LB: loop body
LE: loop exit
PB: predicated region body
PF: predicated region fallthrough
CT: control target
= control target key end

     0   :  { %s22_s0 = inlined_call_operand.vmem [shape: f32[10], index: 0, kind: input, shape index: {}]   ;;  %s23_s1 = inlined_call_operand.vmem [shape: f32[5,10], index: 1, kind: output, shape index: {}]  }
   0x1   :  { %v4_v0 = vld [vmem:[%s22_s0] ss:$0 sm:$0xff] }
   0x2   :  { %5 = vst [vmem:[%s23_s1] sm:$0xff] %v4_v0 }

// kernel: tile.19
= control target key start
LH: loop header
LB: loop body
LE: loop exit
PB: predicated region body
PF: predicated region fallthrough
CT: control target
= control target key end

     0   :  { %s43_s10 = smov 40   ;;  %s44_s11 = smov 20   ;;  %vm3_vm0 = vcmask 80896   ;;  %vm9_vm1 = vcmask 408896   ;;  %vm15_vm2 = vcmask 326896   ;;  %vm21_vm3 = vcmask 244896   ;;  %s75_s0 = inlined_call_operand.vmem [shape: f32[5,10], index: 0, kind: input, shape index: {}]   ;;  %s76_s1 = inlined_call_operand.vmem [shape: f32[1,50], index: 1, kind: output, shape index: {}]  }
   0x1   :  { %v35_v0 = vld [vmem:[%s75_s0 + $0x4] sm:$0x1]   ;;  %v37_v1 = vld [vmem:[%s75_s0 + $0x2] sm:$0x1]   ;;  %v36_v2 = vld [vmem:[%s75_s0 + $0x3] sm:$0x1]  }
   0x2   :  { %7 = vrot.lane.b32.xlu0 %v35_v0, %s43_s10  ;;  %19 = vrot.lane.b32.xlu1 %v37_v1, %s44_s11  ;;  %v38_v3 = vld [vmem:[%s75_s0 + $0x1] sm:$0x1]   ;;  %v2_v4 = vld [vmem:[%s75_s0] sm:$0x1]   ;;  %s45_s0 = smov 30   ;;  %s46_s18 = smov 10  }
   0x3   :  { %4 = vst.msk [vmem:[#allocation0] sm:$0x1] %vm3_vm0, %v2_v4   ;;  %vm27_vm4 = vcmask 162896  }
   0x6   :  { %13 = vrot.lane.b32.xlu0 %v36_v2, %s45_s0  ;;  %25 = vrot.lane.b32.xlu1 %v38_v3, %s46_s18 }
  0x74   :  { %v8_v5 = vpop.permute.xlu0 %7   ;;  %v20_v6 = vpop.permute.xlu1 %19  }
  0x75   :  { %10 = vst.msk [vmem:[#allocation0] sm:$0x1] %vm9_vm1, %v8_v5  }
  0x78   :  { %v14_v7 = vpop.permute.xlu0 %13   ;;  %v26_v8 = vpop.permute.xlu1 %25  }
  0x79   :  { %16 = vst.msk [vmem:[#allocation0] sm:$0x1] %vm15_vm2, %v14_v7  }
  0x7a   :  { %22 = vst.msk [vmem:[#allocation0] sm:$0x1] %vm21_vm3, %v20_v6  }
  0x7b   :  { %28 = vst.msk [vmem:[#allocation0] sm:$0x1] %vm27_vm4, %v26_v8  }
  0x82   :  { %v32_v9 = vld [vmem:[#allocation0] sm:$0x1] }
  0x83   :  { %34 = vst [vmem:[%s76_s1] sm:$0x1] %v32_v9 }

// kernel: stn_forward.1
= control target key start
LH: loop header
LB: loop body
LE: loop exit
PB: predicated region body
PF: predicated region fallthrough
CT: control target
= control target key end

     0   :  { %s4742_s21 = smov 0   ;;  %s5858_s0 = inlined_call_operand.vmem [shape: f32[2,24,24], index: 0, kind: input, shape index: {}]   ;;  %s5859_s1 = inlined_call_operand.vmem [shape: f32[7,24,144], index: 1, kind: input, shape index: {}]   ;;  %s5860_s2 = inlined_call_operand.vmem [shape: f32[1,144], index: 2, kind: input, shape index: {}]   ;;  %s5861_s3 = inlined_call_operand.vmem [shape: f32[144,256], index: 3, kind: input, shape index: {}]   ;;  %s5862_s4 = inlined_call_operand.vmem [shape: f32[32,18], index: 4, kind: input, shape index: {}]   ;;  %s5863_s5 = inlined_call_operand.vmem [shape: f32[5,72,50], index: 5, kind: input, shape index: {}]   ;;  %s5864_s6 = inlined_call_operand.vmem [shape: f32[1,50], index: 6, kind: input, shape index: {}]   ;;  %s5865_s7 = inlined_call_operand.vmem [shape: f32[50,256], index: 7, kind: input, shape index: {}]   ;;  %s5866_s8 = inlined_call_operand.vmem [shape: f32[32,5], index: 8, kind: input, shape index: {}]   ;;  %s5867_s9 = inlined_call_operand.vmem [shape: f32[2,20,32], index: 9, kind: input, shape index: {}]   ;;  %s5868_s10 = inlined_call_operand.vmem [shape: f32[1,32], index: 10, kind: input, shape index: {}]   ;;  %s5869_s11 = inlined_call_operand.vmem [shape: f32[32,3], index: 11, kind: input, shape index: {}]   ;;  %s5870_s12 = inlined_call_operand.vmem [shape: f32[1,3], index: 12, kind: input, shape index: {}]   ;;  %s5871_s13 = inlined_call_operand.vmem [shape: f32[32,3], index: 13, kind: input, shape index: {}]   ;;  %s5872_s14 = inlined_call_operand.vmem [shape: f32[1,3], index: 14, kind: input, shape index: {}]   ;;  %s5873_s15 = inlined_call_operand.vmem [shape: f32[3,576], index: 15, kind: input, shape index: {}]   ;;  %s5874_s16 = inlined_call_operand.vmem [shape: f32[2,1,576], index: 16, kind: output, shape index: {}]  }
   0x1   :  { %5875 = sst [smem:[#allocation3_spill]] %s5858_s0 }
   0x2 LB: > { %s3925_s22 = sadd.s32 4294967295, %s4650_s21   ;;  %p3929_p0 = scmp.ge.s32.totalorder %s4650_s21, 1  ;;  %s4650_s21 = sphi %s4742_s21, %s26_s21  }
   0x3   : > { %p462_p1 = scmp.lt.s32.totalorder %s4650_s21, 3 }
   0x5   : > { %p463_p2 = pnand %p3929_p0, %p462_p1 }
   0x6   : > { %v3932_v0 = vld [vmem:[%s5859_s1 + $0x38] sm:$0xff] (!%p463_p2)  ;;  %v3934_v1 = vld [vmem:[%s5859_s1 + $0x48] sm:$0xff] (!%p463_p2)  ;;  %v3931_v2 = vld [vmem:[%s5859_s1 + $0x30] sm:$0xff] (!%p463_p2)  ;;  %p511_p3 = scmp.lt.s32.totalorder (!%p463_p2), %s3925_s22, 1  ;;  %v4652_v5 = vmov (!%p463_p2), 0.0   ;;  %s5876_s18 = sld [smem:[#allocation3_spill]] (!%p463_p2) }
   0x7   : > { %466 = sbr.rel (%p463_p2) target bundleno = 2613 (0xa35), region = 84  ;;  %v4388_v3 = vpack.c.bf16 (!%p463_p2), %v3934_v1, %v3932_v0  ;;  %v3933_v4 = vld [vmem:[%s5859_s1 + $0x40] sm:$0xff] (!%p463_p2)  ;;  %613 = vmatprep.mubr.f32.mxu0 (!%p463_p2), %v4652_v5  ;;  %v3936_v7 = vld [vmem:[%s5859_s1 + $0x58] sm:$0xff] (!%p463_p2)  ;;  %v3949_v9 = vld [vmem:[%s5859_s1 + $0xa8] sm:$0xff] (!%p463_p2)  ;;  %vm539_vm0 = vcmask (!%p463_p2), 195584   ;;  %vm1306_vm1 = vcmask (!%p463_p2), 130048  }
   0x8   : > { %v4390_v6 = vpack.c.bf16 (!%p463_p2), %v3933_v4, %v3931_v2  ;;  %v3947_v8 = vld [vmem:[%s5859_s1 + $0x98] sm:$0xff] (!%p463_p2)  ;;  %v3946_v10 = vld [vmem:[%s5859_s1 + $0x90] sm:$0xff] (!%p463_p2)  ;;  %v3948_v11 = vld [vmem:[%s5859_s1 + $0xa0] sm:$0xff] (!%p463_p2)  ;;  %vm1406_vm2 = vcmask (!%p463_p2), 146432   ;;  %vm1419_vm3 = vcmask (!%p463_p2), 1041408   ;;  %vm4654_vm4 = vmmov (!%p463_p2), 0  }
   0x9   : > { %4389 = vmatprep.subr.bf16.mxu0 (!%p463_p2), %v4388_v3  ;;  %v3935_v12 = vld [vmem:[%s5859_s1 + $0x50] sm:$0xff] (!%p463_p2)  ;;  %v4392_v13 = vpack.c.bf16 (!%p463_p2), %v3949_v9, %v3947_v8  ;;  %v4394_v14 = vpack.c.bf16 (!%p463_p2), %v3948_v11, %v3946_v10  ;;  %v3951_v16 = vld [vmem:[%s5859_s1 + $0xb8] sm:$0xff] (!%p463_p2)  ;;  %v3964_v18 = vld [vmem:[%s5859_s1 + $0x108] sm:$0xff] (!%p463_p2)  ;;  %vm1514_vm5 = vcmask (!%p463_p2), 581632   ;;  %vm1512_vm6 = vcmask (!%p463_p2), 588800  }
   0xa   : > { %4391 = vmatpush1.bf16.msra.mxu0 (!%p463_p2), %v4390_v6  ;;  %v3962_v17 = vld [vmem:[%s5859_s1 + $0xf8] sm:$0xff] (!%p463_p2)  ;;  %v3950_v20 = vld [vmem:[%s5859_s1 + $0xb0] sm:$0xff] (!%p463_p2)  ;;  %v3963_v24 = vld [vmem:[%s5859_s1 + $0x100] sm:$0xff] (!%p463_p2)  ;;  %vm1959_vm7 = vcmask (!%p463_p2), 408576   ;;  %vm2045_vm8 = vcmask (!%p463_p2), 39936   ;;  %vm2058_vm9 = vcmask (!%p463_p2), 1044480  }
   0xb   : > { %553 = vmatprep.subr.mxu0 (!%p463_p2), %v3936_v7  ;;  %v4396_v21 = vpack.c.bf16 (!%p463_p2), %v3964_v18, %v3962_v17  ;;  %v3961_v23 = vld [vmem:[%s5859_s1 + $0xf0] sm:$0xff] (!%p463_p2)  ;;  %v3966_v27 = vld [vmem:[%s5859_s1 + $0x118] sm:$0xff] (!%p463_p2)  ;;  %v3971_v29 = vld [vmem:[%s5859_s1 + $0x128] sm:$0xff] (!%p463_p2)  ;;  %vm2157_vm10 = vcmask (!%p463_p2), 1043456   ;;  %vm2153_vm11 = vcmask (!%p463_p2), 162816   ;;  %vm2321_vm12 = vcmask (!%p463_p2), 261120  }
   0xc   : > { %v4398_v26 = vpack.c.bf16 (!%p463_p2), %v3963_v24, %v3961_v23  ;;  %v3973_v30 = vld [vmem:[%s5859_s1 + $0x138] sm:$0xff] (!%p463_p2)  ;;  %v3965_v31 = vld [vmem:[%s5859_s1 + $0x110] sm:$0xff] (!%p463_p2)  ;;  %v1271_v32 = vld [vmem:[%s5861_s3 + $0x8] sm:$0xff] (!%p463_p2)  ;;  %vm2482_vm13 = vcmask (!%p463_p2), 1042432   ;;  %vm2478_vm14 = vcmask (!%p463_p2), 23552  }
   0xd   : > { %v1273_v33 = vld [vmem:[%s5861_s3 + $0x18] sm:$0xff] (!%p463_p2)  ;;  %v1270_v34 = vld [vmem:[%s5861_s3] sm:$0xff] (!%p463_p2)  ;;  %v1272_v36 = vld [vmem:[%s5861_s3 + $0x10] sm:$0xff] (!%p463_p2)  ;;  %v4400_v39 = vpack.c.bf16 (!%p463_p2), %v3973_v30, %v3971_v29 }
   0xe   : > { %s5878_s22 = smov (!%p511_p3, %s3925_s22), 1  ;;  %554 = vmatpush1.msra.mxu0 %v3935_v12  ;;  %v4416_v35 = vpack.c.bf16 %v1273_v33, %v1271_v32  ;;  %v1275_v37 = vld [vmem:[%s5861_s3 + $0x28] sm:$0xff]  ;;  %v1277_v38 = vld [vmem:[%s5861_s3 + $0x38] sm:$0xff]  ;;  %v4418_v40 = vpack.c.bf16 %v1272_v36, %v1270_v34  ;;  %v1274_v42 = vld [vmem:[%s5861_s3 + $0x20] sm:$0xff] }
   0xf   : > { %s4607_s28 = smul.u32 24, %s5878_s22  ;;  %4393 = vmatprep.subr.bf16.mxu0 %v4392_v13  ;;  %v4420_v41 = vpack.c.bf16 %v1277_v38, %v1275_v37  ;;  %v1276_v43 = vld [vmem:[%s5861_s3 + $0x30] sm:$0xff]  ;;  %v1279_v44 = vld [vmem:[%s5861_s3 + $0x48] sm:$0xff]  ;;  %v1281_v45 = vld [vmem:[%s5861_s3 + $0x58] sm:$0xff] }
  0x10   : > { %4417 = vmatprep.subr.bf16.mxu1 %v4416_v35  ;;  %v4422_v46 = vpack.c.bf16 %v1276_v43, %v1274_v42  ;;  %v4424_v48 = vpack.c.bf16 %v1281_v45, %v1279_v44  ;;  %v1278_v49 = vld [vmem:[%s5861_s3 + $0x40] sm:$0xff]  ;;  %v1280_v50 = vld [vmem:[%s5861_s3 + $0x50] sm:$0xff]  ;;  %v1283_v53 = vld [vmem:[%s5861_s3 + $0x68] sm:$0xff] }
  0x11   : > { %s4787_s19 = scalar_lea.vmem %s5876_s18, %s4607_s28  ;;  %4419 = vmatpush1.bf16.msra.mxu1 %v4418_v40  ;;  %v3970_v51 = vld [vmem:[%s5859_s1 + $0x120] sm:$0xff]  ;;  %v3972_v52 = vld [vmem:[%s5859_s1 + $0x130] sm:$0xff]  ;;  %v1285_v54 = vld [vmem:[%s5861_s3 + $0x78] sm:$0xff]  ;;  %v4426_v55 = vpack.c.bf16 %v1280_v50, %v1278_v49 }
  0x12   : > { %v529_v15 = vld [vmem:[%s4787_s19 + $0x1] sm:$0xff]  ;;  %v530_v19 = vld [vmem:[%s4787_s19 + $0x9] sm:$0xff]  ;;  %v531_v22 = vld [vmem:[%s4787_s19 + $0x11] sm:$0x3]  ;;  %4421 = vmatprep.subr.bf16.mxu1 %v4420_v41  ;;  %v4402_v57 = vpack.c.bf16 %v3972_v52, %v3970_v51  ;;  %v4428_v62 = vpack.c.bf16 %v1285_v54, %v1283_v53 }
  0x13   : > { %3937 = vmatmul.mubr.msk.f32.vlgmr.msra.gmra.mrb[0].mxu0 %vm539_vm0, %v529_v15  ;;  %v642_v25 = vld [vmem:[%s4787_s19 + $0x3] sm:$0xff]  ;;  %v643_v28 = vld [vmem:[%s4787_s19 + $0xb] sm:$0xff]  ;;  %v644_v47 = vld [vmem:[%s4787_s19 + $0x13] sm:$0x3] }
  0x14   : > { %619 = vmatprep.mubr.f32.mxu0 %v4652_v5  ;;  %4395 = vmatpush1.bf16.msra.mxu0 %v4394_v14  ;;  %v754_v56 = vld [vmem:[%s4787_s19 + $0x5] sm:$0xff]  ;;  %v1284_v59 = vld [vmem:[%s5861_s3 + $0x70] sm:$0xff]  ;;  %v526_v63 = vld [vmem:[%s5859_s1 + $0x18] sm:$0xff] }
  0x15   : > { %665 = vmatprep.subr.mxu0 %v3951_v16  ;;  %4423 = vmatpush1.bf16.msra.mxu1 %v4422_v46  ;;  %v1282_v58 = vld [vmem:[%s5861_s3 + $0x60] sm:$0xff]  ;;  %v3975_v60 = vld [vmem:[%s5859_s1 + $0x148] sm:$0xff]  ;;  %v1289_v1 = vld [vmem:[%s5861_s3 + $0x98] sm:$0xff] }
  0x16   : > { %4425 = vmatprep.subr.bf16.mxu1 %v4424_v48  ;;  %v524_v61 = vld [vmem:[%s5859_s1 + $0x8] sm:$0xff]  ;;  %v4430_v2 = vpack.c.bf16 %v1284_v59, %v1282_v58  ;;  %v1286_v4 = vld [vmem:[%s5861_s3 + $0x80] sm:$0xff]  ;;  %v1288_v6 = vld [vmem:[%s5861_s3 + $0x90] sm:$0xff] }
  0x17   : > { %3938 = vmatmul.mubr.msk.f32.gmra.mrb[2].mxu0 %vm539_vm0, %v530_v19  ;;  %v1287_v0 = vld [vmem:[%s5861_s3 + $0x88] sm:$0xff]  ;;  %v3974_v7 = vld [vmem:[%s5859_s1 + $0x140] sm:$0xff]  ;;  %v4404_v8 = vpack.c.bf16 %v526_v63, %v524_v61  ;;  %v1293_v11 = vld [vmem:[%s5861_s3 + $0xb8] sm:$0xff]  ;;  %v4434_v12 = vpack.c.bf16 %v1288_v6, %v1286_v4  ;;  %v1254_v6 = vlaneseq }
  0x18   : > { %625 = vmatprep.mubr.f32.mxu0 %v4652_v5  ;;  %666 = vmatpush1.msra.mxu0 %v3950_v20  ;;  %v755_v3 = vld [vmem:[%s4787_s19 + $0xd] sm:$0xff]  ;;  %v4432_v9 = vpack.c.bf16 %v1289_v1, %v1287_v0  ;;  %v756_v13 = vld [vmem:[%s4787_s19 + $0x15] sm:$0x3]  ;;  %v1290_v15 = vld [vmem:[%s5861_s3 + $0xa0] sm:$0xff] }
  0x19   : > { %4397 = vmatprep.subr.bf16.mxu0 %v4396_v21  ;;  %4427 = vmatpush1.bf16.msra.mxu1 %v4426_v55  ;;  %v1291_v10 = vld [vmem:[%s5861_s3 + $0xa8] sm:$0xff]  ;;  %v1292_v16 = vld [vmem:[%s5861_s3 + $0xb0] sm:$0xff]  ;;  %v523_v17 = vld [vmem:[%s5859_s1] sm:$0xff] }
  0x1a   : > { %4429 = vmatprep.subr.bf16.mxu1 %v4428_v62  ;;  %v4436_v14 = vpack.c.bf16 %v1293_v11, %v1291_v10  ;;  %v525_v18 = vld [vmem:[%s5859_s1 + $0x10] sm:$0xff]  ;;  %v1295_v19 = vld [vmem:[%s5861_s3 + $0xc8] sm:$0xff]  ;;  %v1297_v20 = vld [vmem:[%s5861_s3 + $0xd8] sm:$0xff]  ;;  %v4438_v21 = vpack.c.bf16 %v1292_v16, %v1290_v15 }
  0x1b   : > { %3939 = vmatmul.mubr.msk.f32.gmra.mrb[4].mxu0 %vm539_vm0, %v531_v22  ;;  %v856_v22 = vld [vmem:[%s4787_s19 + $0x6] sm:$0xff]  ;;  %v4406_v23 = vpack.c.bf16 %v525_v18, %v523_v17  ;;  %v3943_v29 = vld [vmem:[%s5859_s1 + $0x78] sm:$0xff]  ;;  %v857_v33 = vld [vmem:[%s4787_s19 + $0xe] sm:$0xff] }
  0x1c   : > { %725 = vmatprep.mubr.f32.mxu0 %v4652_v5  ;;  %v1294_v24 = vld [vmem:[%s5861_s3 + $0xc0] sm:$0xff]  ;;  %v1299_v30 = vld [vmem:[%s5861_s3 + $0xe8] sm:$0xff]  ;;  %v1300_v35 = vld [vmem:[%s5861_s3 + $0xf0] sm:$0xff] }
  0x1d   : > { %4431 = vmatpush1.bf16.msra.mxu1 %v4430_v2  ;;  %v1298_v34 = vld [vmem:[%s5861_s3 + $0xe0] sm:$0xff]  ;;  %v858_v40 = vld [vmem:[%s4787_s19 + $0x16] sm:$0x3]  ;;  %v3945_v45 = vld [vmem:[%s5859_s1 + $0x88] sm:$0xff] }
  0x1e   : > { %4433 = vmatprep.subr.bf16.mxu1 %v4432_v9  ;;  %v527_v36 = vld [vmem:[%s5859_s1 + $0x20] sm:$0xff]  ;;  %v3942_v42 = vld [vmem:[%s5859_s1 + $0x70] sm:$0xff]  ;;  %v3956_v46 = vld [vmem:[%s5859_s1 + $0xc8] sm:$0xff] }
  0x1f   : > { %3952 = vmatmul.mubr.msk.f32.vlgmr.msra.gmra.mrb[0].mxu0 %vm539_vm0, %v642_v25  ;;  %v1296_v25 = vld [vmem:[%s5861_s3 + $0xd0] sm:$0xff]  ;;  %v3940_v41 = vld [vmem:[%s5859_s1 + $0x60] sm:$0xff]  ;;  %v521_v48 = vld [vmem:[%s4787_s19 + $0x8] sm:$0xff] }
  0x20   : > { %731 = vmatprep.mubr.f32.mxu0 %v4652_v5  ;;  %4399 = vmatpush1.bf16.msra.mxu0 %v4398_v26  ;;  %v528_v26 = vld [vmem:[%s5859_s1 + $0x28] sm:$0xff]  ;;  %v4442_v32 = vpack.c.bf16 %v1296_v25, %v1294_v24  ;;  %v520_v43 = vld [vmem:[%s4787_s19] sm:$0xff]  ;;  %v4410_v44 = vpack.c.bf16 %v3942_v42, %v3940_v41  ;;  %v522_v51 = vld [vmem:[%s4787_s19 + $0x10] sm:$0x3] }
  0x21   : > { %777 = vmatprep.subr.mxu0 %v3966_v27  ;;  %4435 = vmatpush1.bf16.msra.mxu1 %v4434_v12  ;;  %v3941_v27 = vld [vmem:[%s5859_s1 + $0x68] sm:$0xff]  ;;  %v3944_v49 = vld [vmem:[%s5859_s1 + $0x80] sm:$0xff]  ;;  %v3957_v53 = vld [vmem:[%s5859_s1 + $0xd0] sm:$0xff] }
  0x22   : > { %4437 = vmatprep.subr.bf16.mxu1 %v4436_v14  ;;  %v4408_v37 = vpack.c.bf16 %v3943_v29, %v3941_v27  ;;  %v3955_v52 = vld [vmem:[%s5859_s1 + $0xc0] sm:$0xff]  ;;  %v634_v59 = vld [vmem:[%s4787_s19 + $0x12] sm:$0x3]  ;;  %v746_v62 = vld [vmem:[%s4787_s19 + $0x14] sm:$0x3] }
  0x23   : > { %3953 = vmatmul.mubr.msk.f32.gmra.mrb[2].mxu0 %vm539_vm0, %v643_v28  ;;  %v4440_v28 = vpack.c.bf16 %v1297_v20, %v1295_v19  ;;  %v632_v54 = vld [vmem:[%s4787_s19 + $0x2] sm:$0xff]  ;;  %v4414_v55 = vpack.c.bf16 %v3957_v53, %v3955_v52  ;;  %v745_v61 = vld [vmem:[%s4787_s19 + $0xc] sm:$0xff]  ;;  %v1305_v0 = vld [vmem:[%s5861_s3 + $0x118] sm:$0xff] }
  0x24   : > { %737 = vmatprep.mubr.f32.mxu0 %v4652_v5  ;;  %778 = vmatpush1.msra.mxu0 %v3965_v31  ;;  %v1301_v31 = vld [vmem:[%s5861_s3 + $0xf8] sm:$0xff]  ;;  %v3959_v58 = vld [vmem:[%s5859_s1 + $0xe0] sm:$0xff]  ;;  %v1303_v63 = vld [vmem:[%s5861_s3 + $0x108] sm:$0xff] }
  0x25   : > { %4401 = vmatprep.subr.bf16.mxu0 %v4400_v39  ;;  %4439 = vmatpush1.bf16.msra.mxu1 %v4438_v21  ;;  %v4444_v38 = vpack.c.bf16 %v1301_v31, %v1299_v30  ;;  %v4446_v39 = vpack.c.bf16 %v1300_v35, %v1298_v34  ;;  %v4448_v1 = vpack.c.bf16 %v1305_v0, %v1303_v63  ;;  %v1302_v2 = vld [vmem:[%s5861_s3 + $0x100] sm:$0xff]  ;;  %v3997_v41 = vld [vmem:[%s5863_s5 + $0x50] sm:$0xff]  ;;  %v4000_v52 = vld [vmem:[%s5863_s5 + $0x68] sm:$0xff] }
  0x26   : > { %4441 = vmatprep.subr.bf16.mxu1 %v4440_v28  ;;  %v1252_v9 = vld [vmem:[%s5860_s2] sm:$0x3]  ;;  %v4001_v53 = vld [vmem:[%s5863_s5 + $0x70] sm:$0xff]  ;;  %v4004_v0 = vld [vmem:[%s5863_s5 + $0x88] sm:$0xff] }
  0x27   : > { %3954 = vmatmul.mubr.msk.f32.gmra.mrb[4].mxu0 %vm539_vm0, %v644_v47  ;;  %v3958_v47 = vld [vmem:[%s5859_s1 + $0xd8] sm:$0xff]  ;;  %v1402_v25 = vld [vmem:[%s5862_s4] sm:$0xff] }
  0x28   : > { %837 = vmatprep.mubr.f32.mxu0 %v4652_v5  ;;  %v4412_v50 = vpack.c.bf16 %v3958_v47, %v3956_v46  ;;  %v4025_v42 = vld [vmem:[%s5863_s5 + $0x120] sm:$0xff]  ;;  %v3998_v46 = vld [vmem:[%s5863_s5 + $0x58] sm:$0xff] }
  0x29   : > { %4443 = vmatpush1.bf16.msra.mxu1 %v4442_v32  ;;  %v3999_v47 = vld [vmem:[%s5863_s5 + $0x60] sm:$0xff] }
  0x2a   : > { %4445 = vmatprep.subr.bf16.mxu1 %v4444_v38  ;;  %v1404_v38 = vld [vmem:[%s5862_s4 + $0x10] sm:$0xff] }
  0x2b   : > { %3967 = vmatmul.mubr.msk.f32.vlgmr.msra.gmra.mrb[0].mxu0 %vm539_vm0, %v754_v56  ;;  %v3960_v56 = vld [vmem:[%s5859_s1 + $0xe8] sm:$0xff] }
  0x2c   : > { %843 = vmatprep.mubr.f32.mxu0 %v4652_v5  ;;  %4403 = vmatpush1.bf16.msra.mxu0 %v4402_v57  ;;  %v633_v57 = vld [vmem:[%s4787_s19 + $0xa] sm:$0xff] }
  0x2d   : > { %879 = vmatprep.subr.mxu0 %v3975_v60  ;;  %4447 = vmatpush1.bf16.msra.mxu1 %v4446_v39  ;;  %v744_v60 = vld [vmem:[%s4787_s19 + $0x4] sm:$0xff]  ;;  %v1405_v39 = vld [vmem:[%s5862_s4 + $0x18] sm:$0xff] }
  0x2e   : > { %4449 = vmatprep.subr.bf16.mxu1 %v4448_v1  ;;  %v4033_v1 = vld [vmem:[%s5863_s5 + $0x160] sm:$0xff] }
  0x2f   : > { %3968 = vmatmul.mubr.msk.f32.gmra.mrb[2].mxu0 %vm539_vm0, %v755_v3  ;;  %v1304_v3 = vld [vmem:[%s5861_s3 + $0x110] sm:$0xff] }
  0x30   : > { %849 = vmatprep.mubr.f32.mxu0 %v4652_v5  ;;  %880 = vmatpush1.msra.mxu0 %v3974_v7  ;;  %v4450_v4 = vpack.c.bf16 %v1304_v3, %v1302_v2  ;;  %v5056_v7 = vshrl.u32 %v1254_v6, 7 }
  0x31   : > { %4405 = vmatprep.subr.bf16.mxu0 %v4404_v8 }
  0x32   : > { %4451 = vmatpush1.bf16.msra.mxu1 %v4450_v4  ;;  %v1260_v8 = vsub.s32 1, %v5056_v7  ;;  %v5063_v10 = vsub.s32 0, %v5056_v7 }
  0x33   : > { %3969 = vmatmul.mubr.msk.f32.gmra.mrb[4].mxu0 %vm539_vm0, %v756_v13 }
  0x34   : > { %939 = vmatprep.mubr.f32.mxu0 %v4652_v5  ;;  %v1261_v11 = vrot.slane %v1252_v9, %v1260_v8  ;;  %v1257_v12 = vrot.slane %v1252_v9, %v5063_v10 }
  0x37   : > { %3976 = vmatmul.mubr.msk.f32.vlgmr.msra.gmra.mrb[0].mxu0 %vm539_vm0, %v856_v22 }
  0x38   : > { %945 = vmatprep.mubr.f32.mxu0 %v4652_v5  ;;  %4407 = vmatpush1.bf16.msra.mxu0 %v4406_v23 }
  0x39   : > { %971 = vmatprep.subr.mxu0 %v528_v26  ;;  %v4653_v26 = vmov 0.0|0.0  }
  0x3b   : > { %3977 = vmatmul.mubr.msk.f32.gmra.mrb[2].mxu0 %vm539_vm0, %v857_v33 }
  0x3c   : > { %951 = vmatprep.mubr.f32.mxu0 %v4652_v5  ;;  %972 = vmatpush1.msra.mxu0 %v527_v36 }
  0x3d   : > { %4409 = vmatprep.subr.bf16.mxu0 %v4408_v37  ;;  %v1403_v37 = vld [vmem:[%s5862_s4 + $0x8] sm:$0xff] }
  0x3f   : > { %3978 = vmatmul.mubr.msk.f32.gmra.mrb[4].mxu0 %vm539_vm0, %v858_v40  ;;  %v3996_v40 = vld [vmem:[%s5863_s5 + $0x48] sm:$0xff] }
  0x40   : > { %1031 = vmatprep.mubr.f32.mxu0 %v4652_v5 }
  0x43   : > { %3979 = vmatmul.mubr.msk.f32.vlgmr.msra.gmra.mrb[0].mxu0 %vm539_vm0, %v520_v43  ;;  %v4457_v43 = vpack.c.bf16 %v3997_v41, %v3996_v40  ;;  %v1517_v41 = vld [vmem:[%s5863_s5] sm:$0xff] }
  0x44   : > { %1037 = vmatprep.mubr.f32.mxu0 %v4652_v5  ;;  %4411 = vmatpush1.bf16.msra.mxu0 %v4410_v44  ;;  %v4026_v44 = vld [vmem:[%s5863_s5 + $0x128] sm:$0xff] }
  0x45   : > { %1063 = vmatprep.subr.mxu0 %v3945_v45  ;;  %v4481_v45 = vpack.c.bf16 %v4026_v44, %v4025_v42  ;;  %v1518_v42 = vld [vmem:[%s5863_s5 + $0x8] sm:$0xff]  ;;  %v4014_v44 = vld [vmem:[%s5863_s5 + $0xd0] sm:$0xff] }
  0x47   : > { %3980 = vmatmul.mubr.msk.f32.gmra.mrb[2].mxu0 %vm539_vm0, %v521_v48  ;;  %v4027_v48 = vld [vmem:[%s5863_s5 + $0x130] sm:$0xff] }
  0x48   : > { %1043 = vmatprep.mubr.f32.mxu0 %v4652_v5  ;;  %1064 = vmatpush1.msra.mxu0 %v3944_v49  ;;  %v4460_v49 = vpack.c.bf16 %v3999_v47, %v3998_v46  ;;  %v1519_v46 = vld [vmem:[%s5863_s5 + $0x10] sm:$0xff]  ;;  %v1520_v47 = vld [vmem:[%s5863_s5 + $0x18] sm:$0xff] }
  0x49   : > { %4413 = vmatprep.subr.bf16.mxu0 %v4412_v50  ;;  %v4028_v50 = vld [vmem:[%s5863_s5 + $0x138] sm:$0xff] }
  0x4b   : > { %3981 = vmatmul.mubr.msk.f32.gmra.mrb[4].mxu0 %vm539_vm0, %v522_v51  ;;  %v4484_v51 = vpack.c.bf16 %v4028_v50, %v4027_v48  ;;  %v4496_v50 = vpack.c.bf16 %v1520_v47, %v1519_v46  ;;  %v2152_v46 = vld [vmem:[%s5867_s9 + $0x10] sm:$0xf]  ;;  %v2316_v47 = vld [vmem:[%s5869_s11] sm:$0xff] }
  0x4c   : > { %1123 = vmatprep.mubr.f32.mxu0 %v4652_v5 }
  0x4f   : > { %3982 = vmatmul.mubr.msk.f32.vlgmr.msra.gmra.mrb[0].mxu0 %vm539_vm0, %v632_v54  ;;  %v4029_v54 = vld [vmem:[%s5863_s5 + $0x140] sm:$0xff] }
  0x50   : > { %1129 = vmatprep.mubr.f32.mxu0 %v4652_v5  ;;  %4415 = vmatpush1.bf16.msra.mxu0 %v4414_v55  ;;  %v4463_v55 = vpack.c.bf16 %v4001_v53, %v4000_v52  ;;  %v1522_v52 = vld [vmem:[%s5863_s5 + $0x28] sm:$0xff] }
  0x51   : > { %1155 = vmatprep.subr.mxu0 %v3960_v56  ;;  %v4030_v56 = vld [vmem:[%s5863_s5 + $0x148] sm:$0xff] }
  0x53   : > { %3983 = vmatmul.mubr.msk.f32.gmra.mrb[2].mxu0 %vm539_vm0, %v633_v57  ;;  %v4487_v57 = vpack.c.bf16 %v4030_v56, %v4029_v54  ;;  %v1523_v54 = vld [vmem:[%s5863_s5 + $0x30] sm:$0xff] }
  0x54   : > { %1135 = vmatprep.mubr.f32.mxu0 %v4652_v5  ;;  %1156 = vmatpush1.msra.mxu0 %v3959_v58  ;;  %v4002_v58 = vld [vmem:[%s5863_s5 + $0x78] sm:$0xff] }
  0x55   : > { %4480 = vmatprep.subr.bf16.mxu0 %v4653_v26 }
  0x57   : > { %3984 = vmatmul.mubr.msk.f32.gmra.mrb[4].mxu0 %vm539_vm0, %v634_v59  ;;  %v4003_v59 = vld [vmem:[%s5863_s5 + $0x80] sm:$0xff] }
  0x58   : > { %1215 = vmatprep.mubr.f32.mxu0 %v4652_v5 }
  0x5b   : > { %3985 = vmatmul.mubr.msk.f32.vlgmr.msra.gmra.mrb[0].mxu0 %vm539_vm0, %v744_v60  ;;  %v4031_v60 = vld [vmem:[%s5863_s5 + $0x150] sm:$0xff] }
  0x5c   : > { %1221 = vmatprep.mubr.f32.mxu0 %v4652_v5  ;;  %4482 = vmatpush3.bf16.msra.mxu0 %v4481_v45  ;;  %v4493_v45 = vpack.c.bf16 %v1518_v42, %v1517_v41  ;;  %v2043_v41 = vld [vmem:[%s5866_s8 + $0x10] sm:$0xff]  ;;  %v2044_v42 = vld [vmem:[%s5866_s8 + $0x18] sm:$0xff] }
  0x5d   : > { %4483 = vmatprep.subr.bf16.mxu0 %v4653_v26 }
  0x5f   : > { %3986 = vmatmul.mubr.msk.f32.gmra.mrb[2].mxu0 %vm539_vm0, %v745_v61  ;;  %v4466_v61 = vpack.c.bf16 %v4003_v59, %v4002_v58  ;;  %v1946_v59 = vld [vmem:[%s5865_s7 + $0x8] sm:$0xff] }
  0x60   : > { %1227 = vmatprep.mubr.f32.mxu0 %v4652_v5  ;;  %4485 = vmatpush3.bf16.msra.mxu0 %v4484_v51  ;;  %v1521_v51 = vld [vmem:[%s5863_s5 + $0x20] sm:$0xff] }
  0x61   : > { %4486 = vmatprep.subr.bf16.mxu0 %v4653_v26  ;;  %v4499_v53 = vpack.c.bf16 %v1522_v52, %v1521_v51  ;;  %v4048_v51 = vld [vmem:[%s5867_s9 + $0x18] sm:$0xff]  ;;  %v4049_v52 = vld [vmem:[%s5867_s9 + $0x20] sm:$0xff] }
  0x63   : > { %3987 = vmatmul.mubr.msk.f32.gmra.mrb[4].mxu0 %vm539_vm0, %v746_v62  ;;  %v4032_v62 = vld [vmem:[%s5863_s5 + $0x158] sm:$0xff] }
  0x64   : > { %4488 = vmatpush3.bf16.msra.mxu0 %v4487_v57  ;;  %v4490_v63 = vpack.c.bf16 %v4032_v62, %v4031_v60  ;;  %4261 = vmatprep.mubr.msk.f32.mxu0 %vm4654_vm4, %v4652_v5  ;;  %v1525_v57 = vld [vmem:[%s5863_s5 + $0x40] sm:$0xff]  ;;  %v1948_v60 = vld [vmem:[%s5865_s7 + $0x18] sm:$0xff] }
  0x65   : > { %4489 = vmatprep.subr.bf16.mxu0 %v4653_v26  ;;  %v4516_v62 = vpack.c.bf16 %v1948_v60, %v1946_v59  ;;  %v4050_v60 = vld [vmem:[%s5867_s9 + $0x28] sm:$0xf] }
  0x68   : > { %4491 = vmatpush3.bf16.msra.mxu0 %v4490_v63  ;;  %v1947_v63 = vld [vmem:[%s5865_s7 + $0x10] sm:$0xff] }
  0x69   : > { %4259 = vmatprep.subr.mxu0 %v4652_v5 }
  0x6c   : > { %4260 = vmatpush3.msra.mxu0 %v4033_v1  ;;  %v1952_v1 = vld [vmem:[%s5865_s7 + $0x38] sm:$0xff] }
  0x6d   : > { %4504 = vmatprep.subr.bf16.mxu0 %v4653_v26 }
 0x12e   : > { %v1217_v13 = vpop.f32.mrb[0].mxu0 }
 0x12f   : > { %v1219_v14 = vpop.f32.mrb[1].mxu0  ;;  %v1264_v16 = vadd.f32 %v1257_v12, %v1217_v13 }
 0x130   : > { %v1265_v15 = vadd.f32 %v1261_v11, %v1219_v14  ;;  %v4015_v14 = vld [vmem:[%s5863_s5 + $0xd8] sm:$0xff] }
 0x132   : > { %v1223_v17 = vpop.f32.mrb[2].mxu0  ;;  %3988 = vmatprep.mubr.msk.f32.mxu1 %vm1306_vm1, %v1265_v15  ;;  %v4016_v15 = vld [vmem:[%s5863_s5 + $0xe0] sm:$0xff] }
 0x133   : > { %v1225_v18 = vpop.f32.mrb[3].mxu0  ;;  %1381 = vmatmul.mubr.f32.vlgmr.msra.gmra.mrb[0].mxu1 %v1264_v16  ;;  %v1266_v20 = vadd.f32 %v1257_v12, %v1223_v17  ;;  %v4006_v16 = vld [vmem:[%s5863_s5 + $0x90] sm:$0xff]  ;;  %v4007_v17 = vld [vmem:[%s5863_s5 + $0x98] sm:$0xff] }
 0x134   : > { %v1267_v19 = vadd.f32 %v1261_v11, %v1225_v18  ;;  %v4469_v18 = vpack.c.bf16 %v4016_v15, %v4015_v14  ;;  %v1953_v14 = vld [vmem:[%s5865_s7 + $0x40] sm:$0xff]  ;;  %v1955_v15 = vld [vmem:[%s5865_s7 + $0x50] sm:$0xff] }
 0x136   : > { %v1229_v21 = vpop.f32.mrb[4].mxu0  ;;  %3989 = vmatprep.mubr.msk.f32.mxu1 %vm1306_vm1, %v1267_v19  ;;  %v4505_v19 = vpack.c.bf16 %v4007_v17, %v4006_v16  ;;  %v4526_v16 = vpack.c.bf16 %v1955_v15, %v1953_v14  ;;  %v1958_v17 = vld [vmem:[%s5865_s7 + $0x68] sm:$0x3]  ;;  %v2398_v14 = vld [vmem:[%s5871_s13 + $0x18] sm:$0xff] }
 0x137   : > { %v1231_v22 = vpop.f32.mrb[5].mxu0  ;;  %1387 = vmatmul.mubr.f32.gmra.mrb[2].mxu1 %v1266_v20  ;;  %v1268_v24 = vadd.f32 %v1257_v12, %v1229_v21  ;;  %v4017_v20 = vld [vmem:[%s5863_s5 + $0xe8] sm:$0xff]  ;;  %v4018_v21 = vld [vmem:[%s5863_s5 + $0xf0] sm:$0xff] }
 0x138   : > { %v1269_v23 = vadd.f32 %v1261_v11, %v1231_v22  ;;  %v4008_v22 = vld [vmem:[%s5863_s5 + $0xa0] sm:$0xff] }
 0x13a   : > { %3990 = vmatprep.mubr.msk.f32.mxu1 %vm1306_vm1, %v1269_v23  ;;  %v4009_v23 = vld [vmem:[%s5863_s5 + $0xa8] sm:$0xff] }
 0x13b   : > { %1393 = vmatmul.mubr.f32.gmra.mrb[4].mxu1 %v1268_v24 }
 0x13c   : > { %4195 = vmatprep.mubr.msk.f32.mxu1 %vm1406_vm2, %v1402_v25 }
 0x206   : > { %v1382_v27 = vpop.f32.mrb[0].mxu1 }
 0x207   : > { %v1384_v28 = vpop.f32.mrb[1].mxu1 }
 0x208   : > { %v1399_v29 = vmax.f32 %v1382_v27, %v1384_v28  ;;  %v4472_v27 = vpack.c.bf16 %v4018_v21, %v4017_v20  ;;  %v4508_v28 = vpack.c.bf16 %v4009_v23, %v4008_v22 }
 0x20a   : > { %v1388_v30 = vpop.f32.mrb[2].mxu1 }
 0x20b   : > { %v1390_v31 = vpop.f32.mrb[3].mxu1 }
 0x20c   : > { %v1400_v32 = vmax.f32 %v1388_v30, %v1390_v31  ;;  %v4020_v30 = vld [vmem:[%s5863_s5 + $0x100] sm:$0xff]  ;;  %v4010_v31 = vld [vmem:[%s5863_s5 + $0xb0] sm:$0xff] }
 0x20e   : > { %v4452_v33 = vpack.c.bf16 %v1400_v32, %v1399_v29  ;;  %v1394_v34 = vpop.f32.mrb[4].mxu1  ;;  %v4019_v29 = vld [vmem:[%s5863_s5 + $0xf8] sm:$0xff] }
 0x20f   : > { %v1396_v35 = vpop.f32.mrb[5].mxu1  ;;  %v4011_v32 = vld [vmem:[%s5863_s5 + $0xb8] sm:$0xff] }
 0x210   : > { %v1401_v36 = vmax.f32 %v1394_v34, %v1396_v35  ;;  %4453 = vmatprep.subr.bf16.mxu1 %v4452_v33  ;;  %v4511_v34 = vpack.c.bf16 %v4011_v32, %v4010_v31  ;;  %v4021_v35 = vld [vmem:[%s5863_s5 + $0x108] sm:$0xff] }
 0x211   : > { %4455 = vmatpush3.bf16.msra.mxu1 %v4452_v33  ;;  %v4475_v33 = vpack.c.bf16 %v4020_v30, %v4019_v29 }
 0x212   : > { %4193 = vmatprep.subr.msk.mxu1 %vm1419_vm3, %v1401_v36 }
 0x215   : > { %4194 = vmatpush3.msk.msra.mxu1 %vm1419_vm3, %v1401_v36  ;;  %v4022_v36 = vld [vmem:[%s5863_s5 + $0x110] sm:$0xff] }
 0x216   : > { %4196 = vmatmul.mubr.msk.f32.vlgmr.msra.gmra.mrb[6].mxu1 %vm1406_vm2, %v1403_v37  ;;  %4456 = vmatprep.subr.bf16.mxu1 %v4653_v26  ;;  %v4012_v37 = vld [vmem:[%s5863_s5 + $0xc0] sm:$0xff] }
 0x217   : > { %4198 = vmatprep.mubr.msk.f32.mxu1 %vm1406_vm2, %v1404_v38  ;;  %4458 = vmatpush3.bf16.msra.mxu1 %v4457_v43  ;;  %v4013_v38 = vld [vmem:[%s5863_s5 + $0xc8] sm:$0xff]  ;;  %v4023_v43 = vld [vmem:[%s5863_s5 + $0x118] sm:$0xff] }
 0x218   : > { %4459 = vmatprep.subr.bf16.mxu1 %v4653_v26  ;;  %v4514_v40 = vpack.c.bf16 %v4013_v38, %v4012_v37 }
 0x21a   : > { %4199 = vmatmul.mubr.msk.f32.gmra.mrb[8].mxu1 %vm1406_vm2, %v1405_v39  ;;  %v4478_v39 = vpack.c.bf16 %v4022_v36, %v4021_v35  ;;  %v2041_v36 = vld [vmem:[%s5866_s8] sm:$0xff] }
 0x21b   : > { %4461 = vmatpush3.bf16.msra.mxu1 %v4460_v49  ;;  %4219 = vmatprep.mubr.msk.f32.mxu1 %vm4654_vm4, %v4652_v5 }
 0x21c   : > { %4462 = vmatprep.subr.bf16.mxu1 %v4653_v26 }
 0x21f   : > { %4464 = vmatpush3.bf16.msra.mxu1 %v4463_v55  ;;  %v1524_v55 = vld [vmem:[%s5863_s5 + $0x38] sm:$0xff] }
 0x220   : > { %4465 = vmatprep.subr.bf16.mxu1 %v4653_v26  ;;  %v4502_v56 = vpack.c.bf16 %v1524_v55, %v1523_v54  ;;  %v4532_v55 = vpack.c.bf16 %v4049_v52, %v4048_v51 }
 0x223   : > { %4467 = vmatpush3.bf16.msra.mxu1 %v4466_v61  ;;  %v1945_v61 = vld [vmem:[%s5865_s7] sm:$0xff] }
 0x224   : > { %4217 = vmatprep.subr.mxu1 %v4652_v5 }
 0x227   : > { %4218 = vmatpush3.msra.mxu1 %v4004_v0  ;;  %v1950_v0 = vld [vmem:[%s5865_s7 + $0x28] sm:$0xff] }
 0x228   : > { %4468 = vmatprep.subr.bf16.mxu1 %v4653_v26 }
 0x2e9   : > { %v4197_v2 = vpop.f32.mrb[6].mxu1 }
 0x2ea   : > { %v1489_v3 = vpop.f32.mrb[7].mxu1 }
 0x2ed   : > { %v4200_v4 = vpop.f32.mrb[8].mxu1 }
 0x2ee   : > { %v1509_v8 = vmax.f32 %v4197_v2, %v4200_v4  ;;  %v1499_v9 = vpop.f32.mrb[9].mxu1  ;;  %v4518_v2 = vpack.c.bf16 %v1947_v63, %v1945_v61  ;;  %v1949_v4 = vld [vmem:[%s5865_s7 + $0x20] sm:$0xff]  ;;  %v2319_v63 = vld [vmem:[%s5869_s11 + $0x18] sm:$0xff] }
 0x2ef   : > { %v1508_v11 = vmax.f32 %v1489_v3, %v1499_v9  ;;  %v4520_v3 = vpack.c.bf16 %v1952_v1, %v1950_v0  ;;  %v2147_v1 = vld [vmem:[%s5868_s10] sm:$0x1] }
 0x2f0   : > { %v1511_v12 = vmax.f32 %v1509_v8, 0.0  ;;  %v1951_v8 = vld [vmem:[%s5865_s7 + $0x30] sm:$0xff] }
 0x2f1   : > { %v1510_v13 = vmax.f32 %v1508_v11, 0.0  ;;  %v4522_v9 = vpack.c.bf16 %v1951_v8, %v1949_v4  ;;  %v1954_v11 = vld [vmem:[%s5865_s7 + $0x48] sm:$0xff] }
 0x2f2   : > { %1515 = vst.msk [vmem:[#allocation2 + $0x8] sm:$0x1] %vm1514_vm5, %v1511_v12  ;;  %v1956_v12 = vld [vmem:[%s5865_s7 + $0x58] sm:$0xff] }
 0x2f3   : > { %1513 = vst.msk [vmem:[#allocation2] sm:$0xff] %vm1512_vm6, %v1510_v13  ;;  %v4524_v13 = vpack.c.bf16 %v1956_v12, %v1954_v11 }
 0x2fa   : > { %v1526_v24 = vld [vmem:[#allocation2 + $0x1] sm:$0x1f] }
 0x2fb   : > { %v1705_v25 = vld [vmem:[#allocation2 + $0x4] sm:$0x1f]  ;;  %4220 = vmatmul.mubr.msk.f32.vlgmr.msra.gmra.mrb[10].mxu1 %vm1512_vm6, %v1526_v24 }
 0x2fc   : > { %4262 = vmatmul.mubr.msk.f32.vlgmr.msra.gmra.mrb[6].mxu0 %vm1512_vm6, %v1705_v25  ;;  %4470 = vmatpush3.bf16.msra.mxu1 %v4469_v18  ;;  %v1621_v48 = vld [vmem:[#allocation2 + $0x3] sm:$0x1f]  ;;  %v1957_v18 = vld [vmem:[%s5865_s7 + $0x60] sm:$0x3] }
 0x2fd   : > { %4506 = vmatpush3.bf16.msra.mxu0 %v4505_v19  ;;  %4471 = vmatprep.subr.bf16.mxu1 %v4653_v26  ;;  %v1610_v49 = vld [vmem:[#allocation2 + $0x2] sm:$0x1f] }
 0x2fe   : > { %4507 = vmatprep.subr.bf16.mxu0 %v4653_v26  ;;  %4240 = vmatprep.mubr.msk.f32.mxu1 %vm4654_vm4, %v4652_v5  ;;  %v1516_v58 = vld [vmem:[#allocation2] sm:$0x1f] }
 0x2ff   : > { %4303 = vmatprep.mubr.msk.f32.mxu0 %vm4654_vm4, %v4652_v5 }
 0x300   : > { %4473 = vmatpush3.bf16.msra.mxu1 %v4472_v27 }
 0x301   : > { %4509 = vmatpush3.bf16.msra.mxu0 %v4508_v28  ;;  %4474 = vmatprep.subr.bf16.mxu1 %v4653_v26 }
 0x302   : > { %4510 = vmatprep.subr.bf16.mxu0 %v4653_v26 }
 0x304   : > { %4476 = vmatpush3.bf16.msra.mxu1 %v4475_v33  ;;  %v4037_v33 = vld [vmem:[%s5864_s6] ss:$0 sm:$0xff] }
 0x305   : > { %4512 = vmatpush3.bf16.msra.mxu0 %v4511_v34  ;;  %4477 = vmatprep.subr.bf16.mxu1 %v4653_v26 }
 0x306   : > { %4513 = vmatprep.subr.bf16.mxu0 %v4653_v26 }
 0x308   : > { %4479 = vmatpush3.bf16.msra.mxu1 %v4478_v39 }
 0x309   : > { %4515 = vmatpush3.bf16.msra.mxu0 %v4514_v40  ;;  %4238 = vmatprep.subr.mxu1 %v4652_v5  ;;  %v2042_v40 = vld [vmem:[%s5866_s8 + $0x8] sm:$0xff] }
 0x30a   : > { %4301 = vmatprep.subr.mxu0 %v4652_v5 }
 0x30c   : > { %4239 = vmatpush3.msra.mxu1 %v4023_v43  ;;  %v2150_v43 = vld [vmem:[%s5867_s9] sm:$0xff] }
 0x30d   : > { %4302 = vmatpush3.msra.mxu0 %v4014_v44  ;;  %4241 = vmatmul.mubr.msk.f32.vlgmr.msra.gmra.mrb[12].mxu1 %vm1512_vm6, %v1621_v48  ;;  %v2151_v44 = vld [vmem:[%s5867_s9 + $0x8] sm:$0xff] }
 0x30e   : > { %4492 = vmatprep.subr.bf16.mxu1 %v4653_v26  ;;  %4304 = vmatmul.mubr.msk.f32.vlgmr.msra.gmra.mrb[8].mxu0 %vm1512_vm6, %v1610_v49  ;;  %v2317_v48 = vld [vmem:[%s5869_s11 + $0x8] sm:$0xff] }
 0x30f   : > { %4494 = vmatpush3.bf16.msra.mxu1 %v4493_v45  ;;  %4282 = vmatprep.mubr.msk.f32.mxu1 %vm4654_vm4, %v4652_v5  ;;  %v4529_v45 = vpack.c.bf16 %v2151_v44, %v2150_v43  ;;  %v4535_v49 = vpack.c.bf16 %v2317_v48, %v2316_v47 }
 0x310   : > { %4495 = vmatprep.subr.bf16.mxu1 %v4653_v26  ;;  %4308 = vmatprep.mubr.msk.f32.mxu0 %vm2045_vm8, %v2041_v36 }
 0x313   : > { %4497 = vmatpush3.bf16.msra.mxu1 %v4496_v50 }
 0x314   : > { %4498 = vmatprep.subr.bf16.mxu1 %v4653_v26 }
 0x317   : > { %4500 = vmatpush3.bf16.msra.mxu1 %v4499_v53 }
 0x318   : > { %4501 = vmatprep.subr.bf16.mxu1 %v4653_v26 }
 0x31b   : > { %4503 = vmatpush3.bf16.msra.mxu1 %v4502_v56 }
 0x31c   : > { %4280 = vmatprep.subr.mxu1 %v4652_v5 }
 0x31f   : > { %4281 = vmatpush3.msra.mxu1 %v1525_v57 }
 0x320   : > { %4283 = vmatmul.mubr.msk.f32.vlgmr.msra.gmra.mrb[14].mxu1 %vm1512_vm6, %v1516_v58  ;;  %4517 = vmatprep.subr.bf16.mxu1 %v4516_v62  ;;  %v2318_v62 = vld [vmem:[%s5869_s11 + $0x10] sm:$0xff] }
 0x321   : > { %2033 = vmatprep.mubr.f32.mxu1 %v4652_v5  ;;  %4519 = vmatpush1.bf16.msra.mxu1 %v4518_v2  ;;  %v4538_v0 = vpack.c.bf16 %v2319_v63, %v2318_v62  ;;  %v2395_v2 = vld [vmem:[%s5871_s13] sm:$0xff] }
 0x322   : > { %4521 = vmatprep.subr.bf16.mxu1 %v4520_v3  ;;  %v2396_v3 = vld [vmem:[%s5871_s13 + $0x8] sm:$0xff] }
 0x323   : > { %v4541_v11 = vpack.c.bf16 %v2396_v3, %v2395_v2 }
 0x325   : > { %4523 = vmatpush1.bf16.msra.mxu1 %v4522_v9 }
 0x326   : > { %4525 = vmatprep.subr.bf16.mxu1 %v4524_v13  ;;  %v2397_v13 = vld [vmem:[%s5871_s13 + $0x10] sm:$0xff] }
 0x327   : > { %v4544_v15 = vpack.c.bf16 %v2398_v14, %v2397_v13 }
 0x329   : > { %4527 = vmatpush1.bf16.msra.mxu1 %v4526_v16  ;;  %v2470_v16 = vld [vmem:[%s5873_s15] sm:$0x77] }
 0x32a   : > { %4038 = vmatprep.subr.msk.mxu1 %vm1419_vm3, %v1958_v17  ;;  %v2476_v17 = vcombine.high %v2470_v16, %v2470_v16 }
 0x32d   : > { %4039 = vmatpush1.msk.msra.mxu1 %vm1419_vm3, %v1957_v18  ;;  %v2472_v18 = vld [vmem:[%s5873_s15 + $0x10] sm:$0x7] }
 0x32e   : > { %4528 = vmatprep.subr.bf16.mxu1 %v4653_v26 }
 0x3ce   : > { %v1606_v19 = vpop.f32.mrb[10].mxu1 }
 0x3cf   : > { %v1785_v20 = vpop.f32.mrb[6].mxu0  ;;  %v4221_v21 = vpop.f32.mrb[11].mxu1 }
 0x3d0   : > { %v4263_v22 = vpop.f32.mrb[7].mxu0  ;;  %v2320_v21 = vld [vmem:[%s5870_s12] sm:$0x1] }
 0x3e0   : > { %v1701_v23 = vpop.f32.mrb[12].mxu1 }
 0x3e1   : > { %v1931_v24 = vpop.f32.mrb[8].mxu0  ;;  %v4242_v25 = vpop.f32.mrb[13].mxu1 }
 0x3e2   : > { %v1932_v27 = vadd.f32 %v1931_v24, %v1701_v23  ;;  %v4305_v28 = vpop.f32.mrb[9].mxu0  ;;  %v2399_v25 = vld [vmem:[%s5872_s14] sm:$0x1] }
 0x3f3   : > { %v1858_v29 = vpop.f32.mrb[14].mxu1 }
 0x3f4   : > { %v1859_v30 = vadd.f32 %v1858_v29, %v1606_v19  ;;  %v4284_v31 = vpop.f32.mrb[15].mxu1  ;;  %v2471_v19 = vld [vmem:[%s5873_s15 + $0x8] sm:$0x77] }
 0x3f6   : > { %v1935_v32 = vadd.f32 %v1932_v27, %v1859_v30 }
 0x3f8   : > { %v1936_v34 = vadd.f32 %v1935_v32, %v1785_v20  ;;  %v2477_v20 = vcombine.high %v2471_v19, %v2471_v19 }
 0x3fa   : > { %v1944_v35 = vadd.f32 %v4037_v33, %v1936_v34 }
 0x3fc   : > { %4040 = vmatmul.mubr.msk.f32.vlgmr.msra.gmra.mrb[16].mxu1 %vm1959_vm7, %v1944_v35 }
 0x3fd   : > { %4320 = vmatprep.mubr.msk.f32.mxu1 %vm4654_vm4, %v4652_v5  ;;  %4530 = vmatpush3.bf16.msra.mxu1 %v4529_v45 }
 0x3fe   : > { %4318 = vmatprep.subr.mxu1 %v4652_v5 }
 0x401   : > { %4319 = vmatpush3.msk.msra.mxu1 %vm2157_vm10, %v2152_v46 }
 0x402   : > { %4531 = vmatprep.subr.bf16.mxu1 %v4653_v26 }
 0x4cf   : > { %v2035_v37 = vpop.f32.mrb[16].mxu1 }
 0x4d0   : > { %v2037_v38 = vpop.f32.mrb[17].mxu1 }
 0x4d1   : > { %v2040_v39 = vmax.f32 %v2035_v37, %v2037_v38 }
 0x4d3   : > { %4306 = vmatprep.subr.msk.mxu0 %vm2058_vm9, %v2040_v39 }
 0x4d4   : > { %4307 = vmatpush3.msk.msra.mxu0 %vm2058_vm9, %v2040_v39 }
 0x4d5   : > { %4309 = vmatmul.mubr.msk.f32.vlgmr.msra.gmra.mrb[10].mxu0 %vm2045_vm8, %v2042_v40  ;;  %4534 = vmatprep.subr.bf16.mxu0 %v4653_v26 }
 0x4d6   : > { %4311 = vmatprep.mubr.msk.f32.mxu0 %vm2045_vm8, %v2043_v41  ;;  %4536 = vmatpush3.bf16.msra.mxu0 %v4535_v49 }
 0x4d7   : > { %4537 = vmatprep.subr.bf16.mxu0 %v4653_v26 }
 0x4d9   : > { %4312 = vmatmul.mubr.msk.f32.gmra.mrb[12].mxu0 %vm2045_vm8, %v2044_v42 }
 0x4da   : > { %4340 = vmatprep.mubr.msk.f32.mxu0 %vm4654_vm4, %v4652_v5  ;;  %4539 = vmatpush3.bf16.msra.mxu0 %v4538_v0 }
 0x4db   : > { %4540 = vmatprep.subr.bf16.mxu0 %v4653_v26 }
 0x5a8   : > { %v4310_v50 = vpop.f32.mrb[10].mxu0 }
 0x5a9   : > { %v2128_v53 = vpop.f32.mrb[11].mxu0 }
 0x5aa   : > { %v2148_v54 = vmax.f32 %v2128_v53, %v4310_v50 }
 0x5ac   : > { %v2149_v56 = vmax.f32 %v2148_v54, 0.0  ;;  %v4313_v57 = vpop.f32.mrb[12].mxu0 }
 0x5ad   : > { %v2138_v58 = vpop.f32.mrb[13].mxu0 }
 0x5ae   : > { %4321 = vmatmul.mubr.msk.f32.vlgmr.msra.gmra.mrb[18].mxu1 %vm2153_vm11, %v2149_v56  ;;  %v2232_v59 = vmax.f32 %v2138_v58, %v4313_v57 }
 0x5af   : > { %4533 = vmatpush3.bf16.msra.mxu1 %v4532_v55  ;;  %4329 = vmatprep.mubr.msk.f32.mxu1 %vm4654_vm4, %v4652_v5 }
 0x5b0   : > { %4327 = vmatprep.subr.mxu1 %v4652_v5  ;;  %v2233_v61 = vmax.f32 %v2232_v59, 0.0 }
 0x5b3   : > { %4328 = vmatpush3.msk.msra.mxu1 %vm2157_vm10, %v4050_v60 }
 0x5b4   : > { %4055 = vmatprep.subr.msk.mxu1 %vm2482_vm13, %v2476_v17 }
 0x5b6   : > { %4330 = vmatmul.mubr.msk.f32.vlgmr.msra.gmra.mrb[18].mxu1 %vm2153_vm11, %v2233_v61 }
 0x5b7   : > { %2557 = vmatprep.mubr.f32.mxu1 %v4652_v5  ;;  %4056 = vmatpush1.msk.msra.mxu1 %vm2482_vm13, %v2470_v16 }
 0x5b8   : > { %4058 = vmatprep.subr.msk.mxu1 %vm2482_vm13, %v2477_v20 }
 0x689   : > { %v2310_v4 = vpop.f32.mrb[18].mxu1 }
 0x68a   : > { %v4568_v8 = vadd.f32 %v2310_v4, %v2147_v1  ;;  %v4331_v9 = vpop.f32.mrb[19].mxu1 }
 0x68c   : > { %v2315_v12 = vmax.f32 %v4568_v8, 0.0 }
 0x68e   : > { %4341 = vmatmul.mubr.msk.f32.vlgmr.msra.gmra.mrb[14].mxu0 %vm2321_vm12, %v2315_v12 }
 0x68f   : > { %4542 = vmatpush3.bf16.msra.mxu0 %v4541_v11  ;;  %4351 = vmatprep.mubr.msk.f32.mxu0 %vm4654_vm4, %v4652_v5 }
 0x690   : > { %4543 = vmatprep.subr.bf16.mxu0 %v4653_v26 }
 0x693   : > { %4545 = vmatpush3.bf16.msra.mxu0 %v4544_v15 }
 0x694   : > { %4354 = vmatprep.subr.mxu0 %v4652_v5 }
 0x696   : > { %4352 = vmatmul.mubr.msk.f32.vlgmr.msra.gmra.mrb[16].mxu0 %vm2321_vm12, %v2315_v12 }
 0x697   : > { %4356 = vmatprep.mubr.msk.f32.mxu0 %vm4654_vm4, %v4652_v5  ;;  %4355 = vmatpush3.msk.msra.mxu0 %vm2482_vm13, %v2472_v18 }
 0x698   : > { %4071 = vmatprep.subr.msk.mxu0 %vm2482_vm13, %v2477_v20 }
 0x761   : > { %v2391_v22 = vpop.f32.mrb[14].mxu0 }
 0x762   : > { %v2392_v23 = vadd.f32 %v2391_v22, %v2320_v21  ;;  %v4342_v24 = vpop.f32.mrb[15].mxu0 }
 0x764   : > { %4057 = vmatmul.mubr.msk.f32.vlgmr.msra.gmra.mrb[20].mxu1 %vm2478_vm14, %v2392_v23  ;;  %4357 = vmatmul.mubr.msk.f32.vlgmr.msra.gmra.mrb[18].mxu0 %vm2478_vm14, %v2392_v23 }
 0x765   : > { %4059 = vmatpush1.msk.msra.mxu1 %vm2482_vm13, %v2471_v19  ;;  %2628 = vmatprep.mubr.f32.mxu1 %v4652_v5 }
 0x766   : > { %4068 = vmatprep.subr.msk.mxu1 %vm2482_vm13, %v2476_v17  ;;  %4072 = vmatpush1.msk.msra.mxu0 %vm2482_vm13, %v2471_v19 }
 0x767   : > { %2858 = vmatprep.mubr.f32.mxu0 %v4652_v5 }
 0x768   : > { %4060 = vmatmul.mubr.msk.f32.vlgmr.msra.gmra.mrb[22].mxu1 %vm2478_vm14, %v2392_v23 }
 0x769   : > { %v2466_v27 = vpop.f32.mrb[16].mxu0  ;;  %4069 = vmatpush1.msk.msra.mxu1 %vm2482_vm13, %v2470_v16  ;;  %2787 = vmatprep.mubr.f32.mxu1 %v4652_v5 }
 0x76a   : > { %v2467_v28 = vadd.f32 %v2466_v27, %v2399_v25  ;;  %v4353_v29 = vpop.f32.mrb[17].mxu0  ;;  %4359 = vmatprep.subr.mxu1 %v4652_v5 }
 0x76c   : > { %4073 = vmatmul.mubr.msk.f32.vlgmr.msra.gmra.mrb[20].mxu0 %vm2478_vm14, %v2467_v28  ;;  %4070 = vmatmul.mubr.msk.f32.vlgmr.msra.gmra.mrb[24].mxu1 %vm2478_vm14, %v2467_v28 }
 0x76d   : > { %4360 = vmatpush3.msk.msra.mxu1 %vm2482_vm13, %v2472_v18  ;;  %4361 = vmatprep.mubr.msk.f32.mxu1 %vm4654_vm4, %v4652_v5 }
 0x76e   : > { %3410 = vmatprep.mubr.f32.mxu0 %v4652_v5 }
 0x770   : > { %4362 = vmatmul.mubr.msk.f32.vlgmr.msra.gmra.mrb[26].mxu1 %vm2478_vm14, %v2467_v28  ;;  %v5427_v28 = vadd.s32 8, %v5056_v7 }
 0x771   : > { %3493 = vmatprep.mubr.f32.mxu1 %v4652_v5 }
 0x837   : > { %v2559_v30 = vpop.f32.mrb[20].mxu1  ;;  %v2701_v31 = vpop.f32.mrb[18].mxu0 }
 0x838   : > { %v2560_v32 = vadd.f32 1.0, %v2559_v30  ;;  %v2702_v33 = vadd.f32 1.0, %v2701_v31  ;;  %v2561_v34 = vpop.f32.mrb[21].mxu1  ;;  %v4358_v35 = vpop.f32.mrb[19].mxu0 }
 0x839   : > { %v2562_v36 = vadd.f32 1.0, %v2561_v34 }
 0x83a   : > { %v2705_v37 = vmul.f32 24.0, %v2560_v32  ;;  %v2709_v38 = vmul.f32 24.0, %v2702_v33  ;;  %v5433_v32 = vadd.s32 16, %v5056_v7 }
 0x83b   : > { %v2706_v39 = vmul.f32 24.0, %v2562_v36  ;;  %v2630_v40 = vpop.f32.mrb[22].mxu1 }
 0x83c   : > { %v4063_v41 = vadd.f32 -1.0, %v2705_v37  ;;  %v4067_v42 = vadd.f32 -1.0, %v2709_v38  ;;  %v2631_v43 = vadd.f32 1.0, %v2630_v40  ;;  %v2632_v44 = vpop.f32.mrb[23].mxu1 }
 0x83d   : > { %v4064_v45 = vadd.f32 -1.0, %v2706_v39  ;;  %v2633_v46 = vadd.f32 1.0, %v2632_v44 }
 0x83e   : > { %v2715_v47 = vmul.f32 0.5, %v4063_v41  ;;  %v2719_v48 = vmul.f32 0.5, %v4067_v42  ;;  %v2707_v49 = vmul.f32 24.0, %v2631_v43 }
 0x83f   : > { %v2716_v50 = vmul.f32 0.5, %v4064_v45  ;;  %v2708_v51 = vmul.f32 24.0, %v2633_v46  ;;  %v2860_v52 = vpop.f32.mrb[20].mxu0  ;;  %v2789_v53 = vpop.f32.mrb[24].mxu1 }
 0x840   : > { %v2950_v54 = vfloor.f32 %v2715_v47  ;;  %v2954_v55 = vfloor.f32 %v2719_v48  ;;  %v4065_v56 = vadd.f32 -1.0, %v2707_v49  ;;  %v2862_v57 = vpop.f32.mrb[21].mxu0  ;;  %v2791_v58 = vpop.f32.mrb[25].mxu1  ;;  %v2861_v11 = vadd.f32 1.0, %v2860_v52 }
 0x841   : > { %v2951_v59 = vfloor.f32 %v2716_v50  ;;  %v4066_v60 = vadd.f32 -1.0, %v2708_v51  ;;  %v2790_v14 = vadd.f32 1.0, %v2789_v53  ;;  %v2863_v27 = vadd.f32 1.0, %v2862_v57 }
 0x842   : > { %v2980_v61 = vmax.f32 %v2950_v54, -2.0  ;;  %v2984_v62 = vmax.f32 %v2954_v55, -2.0  ;;  %v2717_v63 = vmul.f32 0.5, %v4065_v56  ;;  %v2960_v4 = vsub.f32 %v2715_v47, %v2950_v54 }
 0x843   : > { %v2931_v0 = vpop.f32.mrb[26].mxu1  ;;  %v2981_v1 = vmax.f32 %v2951_v59, -2.0  ;;  %v2718_v2 = vmul.f32 0.5, %v4066_v60  ;;  %v2964_v9 = vsub.f32 %v2719_v48, %v2954_v55  ;;  %v2961_v18 = vsub.f32 %v2716_v50, %v2951_v59 }
 0x844   : > { %v4363_v3 = vpop.f32.mrb[27].mxu1  ;;  %v2985_v8 = vmin.f32 %v2980_v61, 24.0  ;;  %v2989_v12 = vmin.f32 %v2984_v62, 24.0  ;;  %v2952_v13 = vfloor.f32 %v2717_v63  ;;  %v2965_v17 = vsub.f32 1.0, %v2960_v4 }
 0x845   : > { %v2986_v15 = vmin.f32 %v2981_v1, 24.0  ;;  %v2953_v16 = vfloor.f32 %v2718_v2  ;;  %v2969_v21 = vsub.f32 1.0, %v2964_v9  ;;  %v2937_v23 = vmul.f32 24.0, %v2861_v11 }
 0x846   : > { %v2982_v19 = vmax.f32 %v2952_v13, -2.0  ;;  %v4609_v20 = vtrunc.f32 %v2985_v8  ;;  %v4617_v24 = vtrunc.f32 %v2989_v12  ;;  %v2935_v25 = vmul.f32 24.0, %v2790_v14 }
 0x847   : > { %v2983_v22 = vmax.f32 %v2953_v16, -2.0  ;;  %v5430_v29 = vrot.slane %v2960_v4, %v5063_v10  ;;  %v4611_v30 = vtrunc.f32 %v2986_v15  ;;  %v5436_v33 = vrot.slane %v2965_v17, %v5063_v10 }
 0x848   : > { %v2987_v31 = vmin.f32 %v2982_v19, 24.0  ;;  %v5439_v34 = vrot.slane %v2964_v9, %v5063_v10  ;;  %v2966_v35 = vsub.f32 1.0, %v2961_v18  ;;  %v4610_v37 = vcvt.f32.s32 %v4609_v20 }
 0x849   : > { %v2988_v36 = vmin.f32 %v2983_v22, 24.0  ;;  %v5442_v38 = vrot.slane %v2969_v21, %v5063_v10  ;;  %v5445_v39 = vrot.slane %v2961_v18, %v5063_v10  ;;  %v4078_v40 = vadd.f32 -1.0, %v2937_v23 }
 0x84a   : > { %v4618_v41 = vcvt.f32.s32 %v4617_v24  ;;  %v4613_v42 = vtrunc.f32 %v2987_v31  ;;  %v4076_v43 = vadd.f32 -1.0, %v2935_v25  ;;  %v2938_v44 = vmul.f32 24.0, %v2863_v27 }
 0x84b   : > { %v4612_v45 = vcvt.f32.s32 %v4611_v30  ;;  %v4615_v46 = vtrunc.f32 %v2988_v36  ;;  %v2947_v47 = vmul.f32 0.5, %v4078_v40  ;;  %v2792_v48 = vadd.f32 1.0, %v2791_v58 }
 0x84c   : > { %v5448_v49 = vrot.slane %v2966_v35, %v5063_v10  ;;  %v2962_v50 = vsub.f32 %v2717_v63, %v2952_v13  ;;  %v2945_v51 = vmul.f32 0.5, %v4076_v43  ;;  %v4079_v52 = vadd.f32 -1.0, %v2938_v44 }
 0x84d   : > { %v5451_v53 = vrot.slane %v4610_v37, %v5063_v10  ;;  %v3244_v54 = vadd.s32 1, %v4610_v37  ;;  %v2963_v55 = vsub.f32 %v2718_v2, %v2953_v16  ;;  %v2936_v56 = vmul.f32 24.0, %v2792_v48 }
 0x84e   : > { %v3248_v57 = vadd.s32 1, %v4618_v41  ;;  %v4614_v59 = vcvt.f32.s32 %v4613_v42  ;;  %v2955_v60 = vfloor.f32 %v2945_v51  ;;  %v5453_v61 = vmul.f32 0.5, %v4079_v52 }
 0x84f   : > { %v3245_v62 = vadd.s32 1, %v4612_v45  ;;  %v4616_v1 = vcvt.f32.s32 %v4615_v46  ;;  %v2957_v58 = vfloor.f32 %v2947_v47  ;;  %v4077_v3 = vadd.f32 -1.0, %v2936_v56 }
 0x850   : > { %v5456_v4 = vrot.slane %v4618_v41, %v5063_v10  ;;  %v2967_v63 = vsub.f32 1.0, %v2962_v50  ;;  %v2995_v8 = vmax.f32 %v2955_v60, -2.0  ;;  %v2932_v9 = vadd.f32 1.0, %v2931_v0 }
 0x851   : > { %v5459_v11 = vrot.slane %v4612_v45, %v5063_v10  ;;  %v2968_v2 = vsub.f32 1.0, %v2963_v55  ;;  %v2958_v12 = vfloor.f32 %v5453_v61  ;;  %v2946_v13 = vmul.f32 0.5, %v4077_v3 }
 0x852   : > { %v5463_v14 = vrot.slane %v3244_v54, %v5063_v10  ;;  %v5466_v15 = vrot.slane %v3248_v57, %v5063_v10  ;;  %v3246_v16 = vadd.s32 1, %v4614_v59  ;;  %v5469_v17 = vrot.slane %v2962_v50, %v5063_v10 }
 0x853   : > { %v3256_v18 = vrot.slane %v3245_v62, %v5063_v10  ;;  %v3247_v0 = vadd.s32 1, %v4616_v1  ;;  %v2997_v19 = vmax.f32 %v2957_v58, -2.0  ;;  %v2956_v20 = vfloor.f32 %v2946_v13 }
 0x854   : > { %v5473_v21 = vrot.slane %v2967_v63, %v5063_v10  ;;  %v5475_v22 = vsub.f32 %v2945_v51, %v2955_v60  ;;  %v3000_v23 = vmin.f32 %v2995_v8, 24.0  ;;  %v2939_v24 = vmul.f32 24.0, %v2932_v9 }
 0x855   : > { %v5478_v25 = vrot.slane %v2968_v2, %v5063_v10  ;;  %v5481_v27 = vrot.slane %v2963_v55, %v5063_v10  ;;  %v2998_v30 = vmax.f32 %v2958_v12, -2.0  ;;  %vm3195_vm15 = vcmp.eq.s32.totalorder %v5056_v7, %v5459_v11 }
 0x856   : > { %v5488_v31 = vrot.slane %v4614_v59, %v5063_v10  ;;  %v5491_v35 = vrot.slane %v3246_v16, %v5063_v10  ;;  %v5494_v36 = vrot.slane %v4616_v1, %v5063_v10  ;;  %v2996_v37 = vmax.f32 %v2956_v20, -2.0 }
 0x857   : > { %v5497_v40 = vrot.slane %v3247_v0, %v5063_v10  ;;  %v5499_v41 = vsub.f32 %v2947_v47, %v2957_v58  ;;  %v3002_v42 = vmin.f32 %v2997_v19, 24.0  ;;  %vm3200_vm1 = vcmp.eq.s32.totalorder %v5427_v28, %v5459_v11 }
 0x858   : > { %v2975_v43 = vsub.f32 1.0, %v5475_v22  ;;  %v5504_v44 = vtrunc.f32 %v3000_v23  ;;  %v4080_v45 = vadd.f32 -1.0, %v2939_v24  ;;  %vm3270_vm2 = vcmp.eq.s32.totalorder %v5056_v7, %v3256_v18 }
 0x859   : > { %v3003_v46 = vmin.f32 %v2998_v30, 24.0  ;;  %v3230_v48 = vsel %vm3195_vm15, %v5448_v49, 0.0  ;;  %vm3275_vm3 = vcmp.eq.s32.totalorder %v5427_v28, %v3256_v18  ;;  %v3305_v50 = vsel %vm3270_vm2, %v5445_v39, 0.0 }
 0x85a   : > { %v3001_v47 = vmin.f32 %v2996_v37, 24.0  ;;  %v3235_v51 = vsel %vm3200_vm1, %v5448_v49, 0.0  ;;  %v3310_v52 = vsel %vm3275_vm3, %v5445_v39, 0.0  ;;  %v3320_v54 = vadd.f32 %v3305_v50, %v3230_v48 }
 0x85b   : > { %v5514_v55 = vrot.slane %v5475_v22, %v5063_v10  ;;  %v3325_v56 = vadd.f32 %v3310_v52, %v3235_v51  ;;  %vm3194_vm5 = vcmp.eq.s32.totalorder %v5056_v7, %v5451_v53  ;;  %vm3199_vm6 = vcmp.eq.s32.totalorder %v5427_v28, %v5451_v53 }
 0x85c   : > { %v5520_v57 = vtrunc.f32 %v3002_v42  ;;  %v4620_v59 = vcvt.f32.s32 %v5504_v44  ;;  %v5523_v60 = vsub.f32 %v2946_v13, %v2956_v20  ;;  %v5525_v62 = vmul.f32 0.5, %v4080_v45 }
 0x85d   : > { %v5527_v1 = vtrunc.f32 %v3003_v46  ;;  %v4546_v58 = vpack.c.bf16 %v3325_v56, %v3320_v54  ;;  %vm3269_vm7 = vcmp.eq.s32.totalorder %v5056_v7, %v5463_v14  ;;  %vm3274_vm8 = vcmp.eq.s32.totalorder %v5427_v28, %v5463_v14 }
 0x85e   : > { %v5533_v3 = vtrunc.f32 %v3001_v47  ;;  %v3229_v63 = vsel %vm3194_vm5, %v5436_v33, 0.0  ;;  %v3234_v8 = vsel %vm3199_vm6, %v5436_v33, 0.0  ;;  %v3304_v9 = vsel %vm3269_vm7, %v5430_v29, 0.0  ;;  %v5577_v47 = vld [vmem:[%s4787_s19] sm:$0xff] }
 0x85f   : > { %4547 = vmatprep.subr.bf16.mxu0 %v4546_v58  ;;  %v3309_v2 = vsel %vm3274_vm8, %v5430_v29, 0.0  ;;  %v3319_v13 = vadd.f32 %v3304_v9, %v3229_v63  ;;  %vm3205_vm9 = vcmp.eq.s32.totalorder %v5433_v32, %v5459_v11  ;;  %vm3280_vm10 = vcmp.eq.s32.totalorder %v5433_v32, %v3256_v18 }
 0x860   : > { %v5544_v16 = vadd.s32 1, %v4620_v59  ;;  %v2959_v0 = vfloor.f32 %v5525_v62  ;;  %v3324_v19 = vadd.f32 %v3309_v2, %v3234_v8  ;;  %v3315_v20 = vsel %vm3280_vm10, %v5445_v39, 0.0 }
 0x861   : > { %v3240_v23 = vsel %vm3205_vm9, %v5448_v49, 0.0  ;;  %vm3197_vm11 = vcmp.eq.s32.totalorder %v5056_v7, %v5494_v36  ;;  %vm3202_vm12 = vcmp.eq.s32.totalorder %v5427_v28, %v5494_v36  ;;  %vm3272_vm13 = vcmp.eq.s32.totalorder %v5056_v7, %v5497_v40 }
 0x862   : > { %v4622_v11 = vcvt.f32.s32 %v5533_v3  ;;  %v4548_v18 = vpack.c.bf16 %v3324_v19, %v3319_v13  ;;  %v3330_v24 = vadd.f32 %v3315_v20, %v3240_v23  ;;  %v3232_v30 = vsel %vm3197_vm11, %v5478_v25, 0.0 }
 0x863   : > { %vm3277_vm14 = vcmp.eq.s32.totalorder %v5427_v28, %v5497_v40  ;;  %v3307_v39 = vsel %vm3272_vm13, %v5481_v27, 0.0  ;;  %vm3204_vm15 = vcmp.eq.s32.totalorder %v5433_v32, %v5451_v53  ;;  %vm3279_vm1 = vcmp.eq.s32.totalorder %v5433_v32, %v5463_v14 }
 0x864   : > { %4549 = vmatpush1.bf16.msra.mxu0 %v4548_v18  ;;  %v3237_v49 = vsel %vm3202_vm12, %v5478_v25, 0.0  ;;  %v3312_v37 = vsel %vm3277_vm14, %v5481_v27, 0.0  ;;  %v3322_v42 = vadd.f32 %v3307_v39, %v3232_v30  ;;  %v3239_v45 = vsel %vm3204_vm15, %v5436_v33, 0.0  ;;  %v5638_v39 = vld [vmem:[%s4787_s19 + $0x10] sm:$0xff] }
 0x865   : > { %3350 = vmatprep.subr.mxu0 %v3330_v24  ;;  %v3327_v46 = vadd.f32 %v3312_v37, %v3237_v49  ;;  %v3314_v48 = vsel %vm3279_vm1, %v5430_v29, 0.0  ;;  %vm3196_vm2 = vcmp.eq.s32.totalorder %v5056_v7, %v5488_v31  ;;  %vm3201_vm3 = vcmp.eq.s32.totalorder %v5427_v28, %v5488_v31 }
 0x866   : > { %v3329_v53 = vadd.f32 %v3314_v48, %v3239_v45  ;;  %v3231_v14 = vsel %vm3196_vm2, %v5473_v21, 0.0  ;;  %v3236_v50 = vsel %vm3201_vm3, %v5473_v21, 0.0  ;;  %vm3271_vm5 = vcmp.eq.s32.totalorder %v5056_v7, %v5491_v35 }
 0x867   : > { %v4550_v33 = vpack.c.bf16 %v3327_v46, %v3322_v42  ;;  %vm3276_vm6 = vcmp.eq.s32.totalorder %v5427_v28, %v5491_v35  ;;  %v3306_v29 = vsel %vm3271_vm5, %v5469_v17, 0.0  ;;  %vm3207_vm7 = vcmp.eq.s32.totalorder %v5433_v32, %v5494_v36 }
 0x868   : > { %3351 = vmatpush1.msra.mxu0 %v3329_v53  ;;  %v3311_v51 = vsel %vm3276_vm6, %v5469_v17, 0.0  ;;  %v3321_v52 = vadd.f32 %v3306_v29, %v3231_v14  ;;  %v3242_v54 = vsel %vm3207_vm7, %v5478_v25, 0.0  ;;  %vm3282_vm8 = vcmp.eq.s32.totalorder %v5433_v32, %v5497_v40 }
 0x869   : > { %4551 = vmatprep.subr.bf16.mxu1 %v4550_v33  ;;  %v3326_v56 = vadd.f32 %v3311_v51, %v3236_v50  ;;  %4081 = vmatmul.mubr.msk.f32.vlgmr.msra.gmra.mrb[22].mxu0 %vm539_vm0, %v5577_v47  ;;  %v3317_v58 = vsel %vm3282_vm8, %v5481_v27, 0.0  ;;  %vm3198_vm9 = vcmp.eq.s32.totalorder %v5056_v7, %v5456_v4  ;;  %vm3203_vm10 = vcmp.eq.s32.totalorder %v5427_v28, %v5456_v4  ;;  %v5603_v27 = vld [vmem:[%s4787_s19 + $0x8] sm:$0xff]  ;;  %s4608_s19 = smul.u32 5, %s5878_s22 }
 0x86a   : > { %v2999_v36 = vmax.f32 %v2959_v0, -2.0  ;;  %v3332_v25 = vadd.f32 %v3317_v58, %v3242_v54  ;;  %4554 = vmatprep.subr.bf16.mxu0 %v4653_v26  ;;  %v3233_v40 = vsel %vm3198_vm9, %v5442_v38, 0.0  ;;  %vm3273_vm11 = vcmp.eq.s32.totalorder %v5056_v7, %v5466_v15  ;;  %3416 = vmatprep.mubr.f32.mxu0 %v4652_v5 }
 0x86b   : > { %v4552_v63 = vpack.c.bf16 %v3326_v56, %v3321_v52  ;;  %vm3278_vm12 = vcmp.eq.s32.totalorder %v5427_v28, %v5466_v15  ;;  %v3308_v8 = vsel %vm3273_vm11, %v5439_v34, 0.0  ;;  %vm3206_vm13 = vcmp.eq.s32.totalorder %v5433_v32, %v5488_v31  ;;  %s519_s26 = scalar_lea.vmem %s5874_s16, %s4608_s19 }
 0x86c   : > { %v3238_v9 = vsel %vm3203_vm10, %v5442_v38, 0.0  ;;  %v3313_v2 = vsel %vm3278_vm12, %v5439_v34, 0.0  ;;  %v3323_v13 = vadd.f32 %v3308_v8, %v3233_v40  ;;  %vm3281_vm14 = vcmp.eq.s32.totalorder %v5433_v32, %v5491_v35 }
 0x86d   : > { %v3085_v19 = vadd.s32 1, %v4622_v11  ;;  %4553 = vmatpush1.bf16.msra.mxu1 %v4552_v63  ;;  %v3328_v20 = vadd.f32 %v3313_v2, %v3238_v9  ;;  %v3316_v23 = vsel %vm3281_vm14, %v5469_v17, 0.0  ;;  %4082 = vmatmul.mubr.msk.f32.gmra.mrb[24].mxu0 %vm539_vm0, %v5603_v27  ;;  %vm3283_vm15 = vcmp.eq.s32.totalorder %v5433_v32, %v5466_v15 }
 0x86e   : > { %v4624_v31 = vcvt.f32.s32 %v5520_v57  ;;  %v3004_v18 = vmin.f32 %v2999_v36, 24.0  ;;  %3433 = vmatprep.subr.mxu1 %v3332_v25  ;;  %v3241_v35 = vsel %vm3206_vm13, %v5473_v21, 0.0  ;;  %3422 = vmatprep.mubr.f32.mxu0 %v4652_v5  ;;  %v5627_v24 = vrot.slane %v4620_v59, %v5063_v10 }
 0x86f   : > { %v4555_v17 = vpack.c.bf16 %v3328_v20, %v3323_v13  ;;  %v3331_v30 = vadd.f32 %v3316_v23, %v3241_v35  ;;  %vm3208_vm1 = vcmp.eq.s32.totalorder %v5433_v32, %v5456_v4  ;;  %v5633_v15 = vrot.slane %v5544_v16, %v5063_v10 }
 0x870   : > { %v2976_v57 = vsub.f32 1.0, %v5523_v60  ;;  %v3318_v21 = vsel %vm3283_vm15, %v5439_v34, 0.0  ;;  %v5643_v44 = vrot.slane %v2975_v43, %v5063_v10  ;;  %v5648_v59 = vrot.slane %v4622_v11, %v5063_v10 }
 0x871   : > { %v4626_v49 = vcvt.f32.s32 %v5527_v1  ;;  %4556 = vmatpush3.bf16.msra.mxu0 %v4555_v17  ;;  %3434 = vmatpush1.msra.mxu1 %v3331_v30  ;;  %v5652_v16 = vrot.slane %v3085_v19, %v5063_v10  ;;  %vm3039_vm2 = vcmp.eq.s32.totalorder %v5427_v28, %v5627_v24  ;;  %vm3114_vm3 = vcmp.eq.s32.totalorder %v5427_v28, %v5633_v15 }
 0x872   : > { %v3086_v34 = vadd.s32 1, %v4624_v31  ;;  %4084 = vmatmul.mubr.msk.f32.vlgmr.msra.gmra.mrb[28].mxu1 %vm539_vm0, %v5577_v47  ;;  %4368 = vmatprep.subr.mxu0 %v4652_v5  ;;  %v3243_v22 = vsel %vm3208_vm1, %v5442_v38, 0.0  ;;  %v3074_v43 = vsel %vm3039_vm2, %v5643_v44, 0.0  ;;  %v2973_v1 = vsub.f32 %v5453_v61, %v2958_v12 }
 0x873   : > { %v5669_v3 = vtrunc.f32 %v3004_v18  ;;  %v3333_v11 = vadd.f32 %v3318_v21, %v3243_v22  ;;  %3499 = vmatprep.mubr.f32.mxu1 %v4652_v5  ;;  %4083 = vmatmul.mubr.msk.f32.gmra.mrb[26].mxu0 %vm539_vm0, %v5638_v39  ;;  %v3149_v37 = vsel %vm3114_vm3, %v5514_v55, 0.0  ;;  %v2977_v42 = vsub.f32 1.0, %v5499_v41 }
 0x874   : > { %v5678_v38 = vrot.slane %v5523_v60, %v5063_v10  ;;  %4370 = vmatprep.mubr.msk.f32.mxu0 %vm4654_vm4, %v4652_v5  ;;  %v5683_v61 = vrot.slane %v2976_v57, %v5063_v10  ;;  %v5685_v4 = vadd.f32 %v3149_v37, %v3074_v43  ;;  %v3087_v12 = vadd.s32 1, %v4626_v49 }
 0x875   : > { %4369 = vmatpush3.msra.mxu0 %v3333_v11  ;;  %v5688_v45 = vrot.slane %v4624_v31, %v5063_v10  ;;  %vm3040_vm5 = vcmp.eq.s32.totalorder %v5427_v28, %v5648_v59  ;;  %vm3115_vm6 = vcmp.eq.s32.totalorder %v5427_v28, %v5652_v16  ;;  %v2974_v60 = vsub.f32 %v5525_v62, %v2959_v0 }
 0x876   : > { %4085 = vmatmul.mubr.msk.f32.gmra.mrb[30].mxu1 %vm539_vm0, %v5603_v27  ;;  %v5700_v46 = vrot.slane %v3086_v34, %v5063_v10  ;;  %v3075_v48 = vsel %vm3040_vm5, %v5683_v61, 0.0  ;;  %v3150_v53 = vsel %vm3115_vm6, %v5678_v38, 0.0  ;;  %4565 = vmatprep.subr.bf16.mxu0 %v4653_v26  ;;  %v5707_v14 = vrot.slane %v5499_v41, %v5063_v10 }
 0x877   : > { %v2978_v50 = vsub.f32 1.0, %v2973_v1  ;;  %v4628_v33 = vcvt.f32.s32 %v5669_v3  ;;  %3505 = vmatprep.mubr.f32.mxu1 %v4652_v5  ;;  %4371 = vmatmul.mubr.msk.f32.vlgmr.msra.gmra.mrb[28].mxu0 %vm539_vm0, %v5577_v47  ;;  %v5713_v62 = vadd.f32 %v3150_v53, %v3075_v48  ;;  %v5716_v0 = vrot.slane %v2973_v1, %v5063_v10 }
 0x878   : > { %4373 = vmatprep.mubr.msk.f32.mxu0 %vm4654_vm4, %v4652_v5  ;;  %v5721_v26 = vrot.slane %v2977_v42, %v5063_v10  ;;  %v5724_v41 = vrot.slane %v4626_v49, %v5063_v10  ;;  %vm3044_vm7 = vcmp.eq.s32.totalorder %v5433_v32, %v5627_v24  ;;  %v5729_v29 = vrot.slane %v3087_v12, %v5063_v10 }
 0x879   : > { %v3079_v47 = vsel %vm3044_vm7, %v5643_v44, 0.0  ;;  %vm3119_vm8 = vcmp.eq.s32.totalorder %v5433_v32, %v5633_v15  ;;  %vm3041_vm9 = vcmp.eq.s32.totalorder %v5427_v28, %v5688_v45  ;;  %v2979_v51 = vsub.f32 1.0, %v2974_v60 }
 0x87a   : > { %4086 = vmatmul.mubr.msk.f32.gmra.mrb[32].mxu1 %vm539_vm0, %v5638_v39  ;;  %v3154_v52 = vsel %vm3119_vm8, %v5514_v55, 0.0  ;;  %v3076_v54 = vsel %vm3041_vm9, %v5721_v26, 0.0  ;;  %vm3116_vm10 = vcmp.eq.s32.totalorder %v5427_v28, %v5700_v46  ;;  %v3088_v56 = vadd.s32 1, %v4628_v33 }
 0x87b   : > { %4374 = vmatmul.mubr.msk.f32.gmra.mrb[30].mxu0 %vm539_vm0, %v5603_v27  ;;  %v5744_v58 = vadd.f32 %v3154_v52, %v3079_v47  ;;  %v3151_v36 = vsel %vm3116_vm10, %v5707_v14, 0.0  ;;  %vm3045_vm11 = vcmp.eq.s32.totalorder %v5433_v32, %v5648_v59  ;;  %3674 = vmatprep.mubr.f32.mxu1 %v4652_v5  ;;  %v5753_v25 = vrot.slane %v2978_v50, %v5063_v10 }
 0x87c   : > { %4376 = vmatprep.mubr.msk.f32.mxu0 %vm4654_vm4, %v4652_v5  ;;  %v5755_v40 = vadd.f32 %v3151_v36, %v3076_v54  ;;  %v3080_v63 = vsel %vm3045_vm11, %v5683_v61, 0.0  ;;  %vm3120_vm12 = vcmp.eq.s32.totalorder %v5433_v32, %v5652_v16  ;;  %vm3042_vm13 = vcmp.eq.s32.totalorder %v5427_v28, %v5724_v41 }
 0x87d   : > { %v3155_v27 = vsel %vm3120_vm12, %v5678_v38, 0.0  ;;  %vm3117_vm14 = vcmp.eq.s32.totalorder %v5427_v28, %v5729_v29  ;;  %vm3046_vm15 = vcmp.eq.s32.totalorder %v5433_v32, %v5688_v45  ;;  %v3077_v9 = vsel %vm3042_vm13, %v5753_v25, 0.0 }
 0x87e   : > { %v5767_v8 = vadd.f32 %v3155_v27, %v3080_v63  ;;  %v3152_v2 = vsel %vm3117_vm14, %v5716_v0, 0.0  ;;  %v3081_v13 = vsel %vm3046_vm15, %v5721_v26, 0.0  ;;  %vm3121_vm1 = vcmp.eq.s32.totalorder %v5433_v32, %v5700_v46 }
 0x87f   : > { %4377 = vmatmul.mubr.msk.f32.gmra.mrb[32].mxu0 %vm539_vm0, %v5638_v39  ;;  %v5774_v19 = vadd.f32 %v3152_v2, %v3077_v9  ;;  %v5779_v20 = vrot.slane %v4628_v33, %v5063_v10  ;;  %v3156_v23 = vsel %vm3121_vm1, %v5707_v14, 0.0  ;;  %v3108_v31 = vrot.slane %v3088_v56, %v5063_v10 }
 0x880   : > { %vm3047_vm2 = vcmp.eq.s32.totalorder %v5433_v32, %v5724_v41  ;;  %vm3122_vm3 = vcmp.eq.s32.totalorder %v5433_v32, %v5729_v29  ;;  %4385 = vmatprep.mubr.msk.f32.mxu0 %vm4654_vm4, %v4652_v5  ;;  %v5789_v18 = vadd.f32 %v3156_v23, %v3081_v13  ;;  %v3068_v35 = vrot.slane %v2979_v51, %v5063_v10 }
 0x881   : > { %v3082_v17 = vsel %vm3047_vm2, %v5753_v25, 0.0  ;;  %v3157_v30 = vsel %vm3122_vm3, %v5716_v0, 0.0  ;;  %v3143_v57 = vrot.slane %v2974_v60, %v5063_v10  ;;  %vm3043_vm5 = vcmp.eq.s32.totalorder %v5427_v28, %v5779_v20 }
 0x882   : > { %v5795_v21 = vadd.f32 %v3157_v30, %v3082_v17  ;;  %v3078_v39 = vsel %vm3043_vm5, %v3068_v35, 0.0  ;;  %vm3118_vm6 = vcmp.eq.s32.totalorder %v5427_v28, %v3108_v31  ;;  %vm3048_vm4 = vcmp.eq.s32.totalorder %v5433_v32, %v5779_v20 }
 0x883   : > { %v3153_v49 = vsel %vm3118_vm6, %v3143_v57, 0.0  ;;  %v3083_v34 = vsel %vm3048_vm4, %v3068_v35, 0.0  ;;  %vm3123_vm7 = vcmp.eq.s32.totalorder %v5433_v32, %v3108_v31  ;;  %vm3109_vm8 = vcmp.eq.s32.totalorder %v5056_v7, %v5633_v15 }
 0x884   : > { %v5803_v22 = vadd.f32 %v3153_v49, %v3078_v39  ;;  %v3158_v43 = vsel %vm3123_vm7, %v3143_v57, 0.0  ;;  %vm3110_vm9 = vcmp.eq.s32.totalorder %v5056_v7, %v5652_v16  ;;  %vm3034_vm10 = vcmp.eq.s32.totalorder %v5056_v7, %v5627_v24 }
 0x885   : > { %v5805_v1 = vadd.f32 %v3158_v43, %v3083_v34  ;;  %v3144_v10 = vsel %vm3109_vm8, %v5514_v55, 0.0  ;;  %vm3035_vm11 = vcmp.eq.s32.totalorder %v5056_v7, %v5648_v59  ;;  %v3145_v28 = vsel %vm3110_vm9, %v5678_v38, 0.0 }
 0x886   : > { %v3069_v32 = vsel %vm3034_vm10, %v5643_v44, 0.0  ;;  %v3070_v11 = vsel %vm3035_vm11, %v5683_v61, 0.0  ;;  %vm3111_vm12 = vcmp.eq.s32.totalorder %v5056_v7, %v5700_v46  ;;  %vm3112_vm13 = vcmp.eq.s32.totalorder %v5056_v7, %v5729_v29 }
 0x887   : > { %v3159_v3 = vadd.f32 %v3144_v10, %v3069_v32  ;;  %v3160_v15 = vadd.f32 %v3145_v28, %v3070_v11  ;;  %vm3036_vm14 = vcmp.eq.s32.totalorder %v5056_v7, %v5688_v45  ;;  %v3146_v44 = vsel %vm3111_vm12, %v5707_v14, 0.0 }
 0x888   : > { %vm3037_vm15 = vcmp.eq.s32.totalorder %v5056_v7, %v5724_v41  ;;  %v3147_v61 = vsel %vm3112_vm13, %v5716_v0, 0.0  ;;  %v3071_v46 = vsel %vm3036_vm14, %v5721_v26, 0.0  ;;  %vm3113_vm1 = vcmp.eq.s32.totalorder %v5056_v7, %v3108_v31 }
 0x889   : > { %v3161_v48 = vadd.f32 %v3146_v44, %v3071_v46  ;;  %v3072_v45 = vsel %vm3037_vm15, %v5753_v25, 0.0  ;;  %vm3038_vm2 = vcmp.eq.s32.totalorder %v5056_v7, %v5779_v20  ;;  %v4655_v13 = vmov 1.0  }
 0x88a   : > { %v3162_v50 = vadd.f32 %v3147_v61, %v3072_v45  ;;  %v3073_v51 = vsel %vm3038_vm2, %v3068_v35, 0.0  ;;  %v4656_v49 = vmov 1966171168  }
 0x88b   : > { %v3830_v34 = vunpack.c.l.s4 %v4656_v49 }
 0x88d   : > { %v3831_v43 = vunpack.c.0.s8 %v3830_v34 }
 0x88f   : > { %v3834_v10 = vsub.s32 %v3831_v43, %v5056_v7 }
 0x93c   : > { %v3412_v37 = vpop.f32.mrb[22].mxu0 }
 0x93d   : > { %v3592_v42 = vmul.f32 %v3412_v37, %v3159_v3  ;;  %v3414_v12 = vpop.f32.mrb[23].mxu0 }
 0x93e   : > { %v3593_v16 = vmul.f32 %v3414_v12, %v3160_v15 }
 0x940   : > { %v3418_v55 = vpop.f32.mrb[24].mxu0 }
 0x941   : > { %v3597_v24 = vmul.f32 %v3418_v55, %v5685_v4  ;;  %v3420_v59 = vpop.f32.mrb[25].mxu0 }
 0x942   : > { %v3598_v38 = vmul.f32 %v3420_v59, %v5713_v62  ;;  %v3148_v62 = vsel %vm3113_vm1, %v3143_v57, 0.0 }
 0x943   : > { %v4559_v60 = vpack.c.bf16 %v3597_v24, %v3592_v42  ;;  %v3163_v54 = vadd.f32 %v3148_v62, %v3073_v51 }
 0x944   : > { %v4557_v53 = vpack.c.bf16 %v3598_v38, %v3593_v16 }
 0x945   : > { %v3495_v4 = vpop.f32.mrb[28].mxu1 }
 0x946   : > { %v3594_v14 = vmul.f32 %v3495_v4, %v3161_v48  ;;  %v3497_v33 = vpop.f32.mrb[29].mxu1  ;;  %v3424_v41 = vpop.f32.mrb[26].mxu0  ;;  %4558 = vmatprep.subr.bf16.mxu1 %v4557_v53 }
 0x947   : > { %v3595_v0 = vmul.f32 %v3497_v33, %v3162_v50  ;;  %v3602_v29 = vmul.f32 %v3424_v41, %v5744_v58  ;;  %v3426_v26 = vpop.f32.mrb[27].mxu0  ;;  %4560 = vmatpush1.bf16.msra.mxu1 %v4559_v60 }
 0x948   : > { %v3603_v47 = vmul.f32 %v3426_v26, %v5767_v8 }
 0x949   : > { %v3501_v52 = vpop.f32.mrb[30].mxu1 }
 0x94a   : > { %v3599_v56 = vmul.f32 %v3501_v52, %v5755_v40  ;;  %v3503_v36 = vpop.f32.mrb[31].mxu1  ;;  %v3578_v25 = vpop.f32.mrb[28].mxu0  ;;  %3614 = vmatprep.subr.mxu1 %v3603_v47 }
 0x94b   : > { %v3600_v63 = vmul.f32 %v3503_v36, %v5774_v19  ;;  %v3596_v27 = vmul.f32 %v3578_v25, %v3163_v54  ;;  %v4372_v9 = vpop.f32.mrb[29].mxu0  ;;  %3615 = vmatpush1.msra.mxu1 %v3602_v29 }
 0x94c   : > { %v4563_v2 = vpack.c.bf16 %v3599_v56, %v3594_v14  ;;  %4090 = vmatmul.mubr.msk.f32.vlgmr.msra.gmra.mrb[34].mxu1 %vm539_vm0, %v4655_v13 }
 0x94d   : > { %v4561_v58 = vpack.c.bf16 %v3600_v63, %v3595_v0  ;;  %v3507_v20 = vpop.f32.mrb[32].mxu1  ;;  %3745 = vmatprep.mubr.f32.mxu1 %v4652_v5 }
 0x94e   : > { %v3604_v8 = vmul.f32 %v3507_v20, %v5789_v18  ;;  %v3509_v23 = vpop.f32.mrb[33].mxu1  ;;  %v3583_v40 = vpop.f32.mrb[30].mxu0 }
 0x94f   : > { %v3605_v31 = vmul.f32 %v3509_v23, %v5795_v21  ;;  %v3601_v35 = vmul.f32 %v3583_v40, %v5803_v22  ;;  %4562 = vmatprep.subr.bf16.mxu1 %v4561_v58  ;;  %v4375_v19 = vpop.f32.mrb[31].mxu0 }
 0x950   : > { %4564 = vmatpush1.bf16.msra.mxu1 %v4563_v2 }
 0x951   : > { %v4566_v17 = vpack.c.bf16 %v3601_v35, %v3596_v27  ;;  %3685 = vmatprep.subr.mxu1 %v3605_v31 }
 0x952   : > { %v3588_v30 = vpop.f32.mrb[32].mxu0 }
 0x953   : > { %v3606_v57 = vmul.f32 %v3588_v30, %v5805_v1  ;;  %4567 = vmatpush3.bf16.msra.mxu0 %v4566_v17  ;;  %v4378_v39 = vpop.f32.mrb[33].mxu0 }
 0x954   : > { %3686 = vmatpush1.msra.mxu1 %v3604_v8  ;;  %4383 = vmatprep.subr.mxu0 %v4652_v5 }
 0x955   : > { %4091 = vmatmul.mubr.msk.f32.vlgmr.msra.gmra.mrb[36].mxu1 %vm539_vm0, %v4655_v13 }
 0x957   : > { %4384 = vmatpush3.msra.mxu0 %v3606_v57 }
 0x958   : > { %4386 = vmatmul.mubr.msk.f32.vlgmr.msra.gmra.mrb[34].mxu0 %vm539_vm0, %v4655_v13  ;;  %vm3869_vm0 = vcmp.lt.s32.totalorder %v1254_v6, 576 }
 0xa1f   : > { %v3676_v18 = vpop.f32.mrb[34].mxu1 }
 0xa20   : > { %v3678_v21 = vpop.f32.mrb[35].mxu1 }
 0xa21   : > { %v3827_v22 = vcombine.low %v3676_v18, %v3678_v21 }
 0xa23   : > { %v3835_v11 = vrot.slane %v3827_v22, %v3834_v10 }
 0xa28   : > { %v3747_v1 = vpop.f32.mrb[36].mxu1 }
 0xa29   : > { %v3749_v28 = vpop.f32.mrb[37].mxu1 }
 0xa2a   : > { %v3828_v32 = vcombine.low %v3747_v1, %v3749_v28 }
 0xa2b   : > { %v3818_v3 = vpop.f32.mrb[34].mxu0 }
 0xa2c   : > { %v3842_v5 = vrot.slane %v3828_v32, %v3834_v10  ;;  %v3849_v37 = vrot.slane %v3818_v3, %v3834_v10  ;;  %v4387_v15 = vpop.f32.mrb[35].mxu0 }
 0xa2e   : > { %v3850_v42 = vcombine.low %v3835_v11, %v3842_v5  ;;  %v3864_v12 = vrot.slane %v3849_v37, %v3834_v10 }
 0xa30   : > { %v3857_v16 = vrot.slane %v3850_v42, %v3834_v10 }
 0xa32   : > { %v3865_v55 = vcombine.low %v3857_v16, %v3864_v12 }
 0xa34   : > { %3871 = vst.msk [vmem:[%s519_s26] sm:$0x1f] %vm3869_vm0, %v3865_v55 }
 0xa35 PF: > { %s26_s21 = sadd.s32 1, %s4650_s21  }
 0xa36   : > { %p23_p4 = scmp.ge.s32.totalorder %s26_s21, 4  }
 0xa38   :  { %25 = sbr.rel (!%p23_p4) target bundleno = 2 (0x2), region = 125 }

</bundles_post_ra>
